<compile_context>
chip_gen: v7x
topology: tpu7x:2x2x1
jax: 0.10.0
libtpu: 0.0.40
codegen_flags: <defaults>
</compile_context>

<pallas_src>
import jax
import jax.numpy as jnp
from jax.experimental import pallas as pl
from jax.experimental.pallas import tpu as pltpu


def _softplus(x):
    # torch.nn.Softplus (beta=1), numerically stable form.
    return jnp.maximum(x, 0.0) + jnp.log1p(jnp.exp(-jnp.abs(x)))


# ---------------------------------------------------------------------------
# Stage A: both NodeEmb MLPs, row-tiled.
# ---------------------------------------------------------------------------
def node_emb_kernel(seq_ref, stru_ref,
                    w1s_ref, b1s_ref, w2s_ref, b2s_ref,
                    w1t_ref, b1t_ref, w2t_ref, b2t_ref,
                    h_ref, g_ref):
    f32 = jnp.float32
    bf16 = jnp.bfloat16

    seq = seq_ref[...]                    # [tile, Ds] f32
    stru = stru_ref[...]                  # [tile, Dn] f32
    ds = seq.shape[1]
    dn = stru.shape[1]

    # No-op casts when the weights already arrive as persistent bf16; if they
    # arrive as f32 the VPU cast hides under the MXU.
    w1s = w1s_ref[...].astype(bf16)
    w2s = w2s_ref[...].astype(bf16)
    w1t = w1t_ref[...].astype(bf16)
    w2t = w2t_ref[...].astype(bf16)

    # --- seq branch: L1 + (zero-padded) residual, relu, L2 + residual, relu
    h = jnp.dot(seq.astype(bf16), w1s, preferred_element_type=f32) + b1s_ref[...]
    if ds == dn:
        h = h + seq
    else:
        # residual only touches the first ds lanes -> no [tile, dn] zeros temp
        h = jnp.concatenate([h[:, :ds] + seq, h[:, ds:]], axis=1)
    h = jnp.maximum(h, 0.0)
    h = jnp.maximum(
        jnp.dot(h.astype(bf16), w2s, preferred_element_type=f32)
        + b2s_ref[...] + h, 0.0)
    h_ref[...] = h.astype(h_ref.dtype)

    # --- struc branch: identity residuals
    g = jnp.maximum(
        jnp.dot(stru.astype(bf16), w1t, preferred_element_type=f32)
        + b1t_ref[...] + stru, 0.0)
    g = jnp.maximum(
        jnp.dot(g.astype(bf16), w2t, preferred_element_type=f32)
        + b2t_ref[...] + g, 0.0)
    g_ref[...] = g.astype(g_ref.dtype)


# ---------------------------------------------------------------------------
# Stage B: tiled distance + softplus + per-row partial reductions.
# Requires square tiles (tm == tn) so the global diagonal of row block i lies
# exactly on the diagonal of tile (i, i).
# ---------------------------------------------------------------------------
def distance_loss_kernel(h_ref, g_ref, off_ref, negdiag_ref, row_acc, diag_acc):
    i = pl.program_id(0)
    j = pl.program_id(1)
    nj = pl.num_programs(1)

    @pl.when(j == 0)
    def _():
        row_acc[...] = jnp.zeros_like(row_acc)
        diag_acc[...] = jnp.zeros_like(diag_acc)

    # distance tile = h_i @ g_j^T : contract the LAST axis of BOTH operands so
    # the MXU consumes g directly (no materialized transpose).
    d = jax.lax.dot_general(
        h_ref[...], g_ref[...],
        dimension_numbers=(((1,), (1,)), ((), ())),
        preferred_element_type=jnp.float32)               # [tile, tile] f32
    sp = _softplus(d)                                      # f32 (v5e-safe)
    row_sum = jnp.sum(sp, axis=1, keepdims=True)           # [tile, 1]

    @pl.when(i != j)
    def _():
        row_acc[...] = row_acc[...] + row_sum

    @pl.when(i == j)
    def _():
        # Diagonal tile: exclude diag from the off-diag sum and compute
        # softplus(-diag) = softplus(diag) - diag from the same softplus pass.
        rr = jax.lax.broadcasted_iota(jnp.int32, d.shape, 0)
        cc = jax.lax.broadcasted_iota(jnp.int32, d.shape, 1)
        on_diag = rr == cc
        sp_diag = jnp.sum(jnp.where(on_diag, sp, 0.0), axis=1, keepdims=True)
        d_diag = jnp.sum(jnp.where(on_diag, d, 0.0), axis=1, keepdims=True)
        row_acc[...] = row_acc[...] + (row_sum - sp_diag)
        diag_acc[...] = diag_acc[...] + (sp_diag - d_diag)

    @pl.when(j == nj - 1)
    def _():
        off_ref[...] = row_acc[...]
        negdiag_ref[...] = diag_acc[...]


# ---------------------------------------------------------------------------
# Wrapper
# ---------------------------------------------------------------------------
def _pick_tile(n):
    # >=256 keeps the 256x256 MXU (v6e/v7x) full; 128 suffices for v5e's
    # 4x128^2. Take the largest candidate dividing N; fall back to a single
    # full-size block (always a legal BlockSpec).
    for t in (512, 256, 128, 64, 32, 16):
        if n % t == 0:
            return t
    return n


def _vmem_limit_bytes(estimate):
    try:
        cap = int(getattr(pltpu.get_tpu_info(), "vmem_capacity_bytes", 64 << 20))
    except Exception:
        cap = 64 << 20
    hi = max(cap - (8 << 20), 32 << 20)     # leave headroom for compiler scratch
    return int(min(max(estimate, 32 << 20), hi))


@jax.jit
def mutual_info(seq, stru, w1s, b1s, w2s, b2s, w1t, b1t, w2t, b2t):
    n, ds = seq.shape
    dn = stru.shape[1]
    assert ds <= dn, "NodeEmb zero-pad residual requires input dim <= node dim"
    tile = _pick_tile(n)
    nb = n // tile
    f32 = jnp.float32
    bf16 = jnp.bfloat16

    # -------------------- stage A: NodeEmb MLPs -----------------------------
    w_bytes = sum(w.size * w.dtype.itemsize for w in (w1s, w2s, w1t, w2t))
    b_bytes = sum(b.size * b.dtype.itemsize for b in (b1s, b2s, b1t, b2t))
    est_a = (2 * (tile * ds * 4 + tile * dn * 4)      # double-buffered inputs
             + 2 * w_bytes + b_bytes                  # resident weights
             + 2 * 2 * tile * dn * 2                  # double-buffered outputs
             + 6 * tile * dn * 4 + (2 << 20))         # f32 intermediates
    cost_a = pl.CostEstimate(
        flops=2 * n * dn * (ds + 3 * dn),
        transcendentals=0,
        bytes_accessed=n * ds * 4 + n * dn * 4 + w_bytes + b_bytes + 2 * n * dn * 2)

    h, g = pl.pallas_call(
        node_emb_kernel,
        out_shape=(jax.ShapeDtypeStruct((n, dn), bf16),
                   jax.ShapeDtypeStruct((n, dn), bf16)),
        grid=(nb,),
        in_specs=[
            pl.BlockSpec((tile, ds), lambda i: (i, 0)),
            pl.BlockSpec((tile, dn), lambda i: (i, 0)),
            pl.BlockSpec((ds, dn), lambda i: (0, 0)),   # weights: constant block
            pl.BlockSpec((1, dn), lambda i: (0, 0)),    # -> stay VMEM-resident
            pl.BlockSpec((dn, dn), lambda i: (0, 0)),
            pl.BlockSpec((1, dn), lambda i: (0, 0)),
            pl.BlockSpec((dn, dn), lambda i: (0, 0)),
            pl.BlockSpec((1, dn), lambda i: (0, 0)),
            pl.BlockSpec((dn, dn), lambda i: (0, 0)),
            pl.BlockSpec((1, dn), lambda i: (0, 0)),
        ],
        out_specs=(pl.BlockSpec((tile, dn), lambda i: (i, 0)),
                   pl.BlockSpec((tile, dn), lambda i: (i, 0))),
        compiler_params=pltpu.CompilerParams(
            dimension_semantics=("parallel",),
            vmem_limit_bytes=_vmem_limit_bytes(est_a)),
        cost_estimate=cost_a,
    )(seq, stru, w1s, b1s, w2s, b2s, w1t, b1t, w2t, b2t)

    # -------------------- stage B: distance + softplus + partial sums -------
    est_b = (2 * 2 * tile * dn * 2        # double-buffered bf16 h/g blocks
             + 4 * tile * tile * 4        # d, sp, per-tile masks
             + 8 * tile * 4               # outputs + scratch
             + (2 << 20))
    cost_b = pl.CostEstimate(
        flops=2 * n * n * dn,
        transcendentals=2 * n * n,        # exp + log1p per element
        bytes_accessed=2 * n * dn * 2 + 2 * n * 4)

    sp_off_rowsum, sp_negdiag = pl.pallas_call(
        distance_loss_kernel,
        out_shape=(jax.ShapeDtypeStruct((n, 1), f32),
                   jax.ShapeDtypeStruct((n, 1), f32)),
        grid=(nb, nb),
        in_specs=[
            pl.BlockSpec((tile, dn), lambda i, j: (i, 0)),   # h: row block
            pl.BlockSpec((tile, dn), lambda i, j: (j, 0)),   # g: column block
        ],
        out_specs=(pl.BlockSpec((tile, 1), lambda i, j: (i, 0)),
                   pl.BlockSpec((tile, 1), lambda i, j: (i, 0))),
        scratch_shapes=[pltpu.VMEM((tile, 1), f32),
                        pltpu.VMEM((tile, 1), f32)],
        compiler_params=pltpu.CompilerParams(
            dimension_semantics=("parallel", "arbitrary"),
            vmem_limit_bytes=_vmem_limit_bytes(est_b)),
        cost_estimate=cost_b,
    )(h, g)

    # -------------------- tiny O(N) epilogue (plain JAX) --------------------
    nf = jnp.float32(n)
    diag_loss = jnp.sum(sp_negdiag) / nf
    off_denom = jnp.maximum(nf * (nf - 1.0), 1.0)   # guard the n == 1 edge case
    undiag_loss = jnp.sum(sp_off_rowsum) / off_denom
    return diag_loss + undiag_loss


# ---------------------------------------------------------------------------
# Plain-JAX reference (faithful to the torch module, incl. flatten/view trick)
# ---------------------------------------------------------------------------
def mutual_info_reference(seq, stru, w1s, b1s, w2s, b2s, w1t, b1t, w2t, b2t,
                          mxu_dtype=jnp.float32):
    n, ds = seq.shape
    dn = stru.shape[1]
    dot = lambda a, b: jnp.dot(a.astype(mxu_dtype), b.astype(mxu_dtype),
                               preferred_element_type=jnp.float32)
    res = seq if ds == dn else jnp.concatenate(
        [seq, jnp.zeros((n, dn - ds), jnp.float32)], axis=1)
    h = jnp.maximum(dot(seq, w1s) + b1s + res, 0.0)
    h = jnp.maximum(dot(h, w2s) + b2s + h, 0.0)
    g = jnp.maximum(dot(stru, w1t) + b1t + stru, 0.0)
    g = jnp.maximum(dot(g, w2t) + b2t + g, 0.0)
    d = dot(h, g.T)
    sp = lambda x: jnp.maximum(x, 0.0) + jnp.log1p(jnp.exp(-jnp.abs(x)))
    diag_loss = jnp.mean(sp(-jnp.diag(d)))
    undiag = d.flatten()[:-1].reshape(n - 1, n + 1)[:, 1:].flatten()
    return diag_loss + jnp.mean(sp(undiag))


if __name__ == "__main__":
    # Small shapes mirroring the module's structure (original: seq 1024 -> 1280,
    # struc 1280 -> 1280).  N=32 with tile=16 exercises a (2, 2) distance grid
    # (diag + off-diag tiles, accumulation over j, parallel row axis), and
    # Ds != Dn exercises the zero-pad residual branch.
    N, D_SEQ, D_NODE = 32, 128, 256

    key = jax.random.PRNGKey(0)
    ks = jax.random.split(key, 10)
    wscale = 0.05
    seq = 0.1 * jax.random.normal(ks[0], (N, D_SEQ), jnp.float32)
    stru = 0.1 * jax.random.normal(ks[1], (N, D_NODE), jnp.float32)
    w1s = wscale * jax.random.normal(ks[2], (D_SEQ, D_NODE), jnp.float32)
    b1s = wscale * jax.random.normal(ks[3], (1, D_NODE), jnp.float32)
    w2s = wscale * jax.random.normal(ks[4], (D_NODE, D_NODE), jnp.float32)
    b2s = wscale * jax.random.normal(ks[5], (1, D_NODE), jnp.float32)
    w1t = wscale * jax.random.normal(ks[6], (D_NODE, D_NODE), jnp.float32)
    b1t = wscale * jax.random.normal(ks[7], (1, D_NODE), jnp.float32)
    w2t = wscale * jax.random.normal(ks[8], (D_NODE, D_NODE), jnp.float32)
    b2t = wscale * jax.random.normal(ks[9], (1, D_NODE), jnp.float32)

    # Persistent bf16 weight copies: converted ONCE here, outside the jitted
    # per-call path (no per-call convert kernels / extra HBM round trips).
    to_bf16 = lambda w: w.astype(jnp.bfloat16)
    kernel_params = (seq, stru,
                     to_bf16(w1s), b1s, to_bf16(w2s), b2s,
                     to_bf16(w1t), b1t, to_bf16(w2t), b2t)
    ref_params = (seq, stru, w1s, b1s, w2s, b2s, w1t, b1t, w2t, b2t)

    loss = jax.block_until_ready(mutual_info(*kernel_params))

    # 1) match the kernel's bf16-matmul / f32-accumulate precision (tight tol)
    ref_bf16 = mutual_info_reference(*ref_params, mxu_dtype=jnp.bfloat16)
    assert jnp.allclose(loss, ref_bf16, rtol=2e-3, atol=2e-3), (loss, ref_bf16)

    # 2) sanity check against the full-f32 reference (looser tol for bf16 MXU)
    ref_f32 = mutual_info_reference(*ref_params, mxu_dtype=jnp.float32)
    assert jnp.allclose(loss, ref_f32, rtol=2e-2, atol=2e-2), (loss, ref_f32)

    print("KERNEL_OK")
</pallas_src>

<mosaic_0001>
module attributes {stable_mosaic.version = 11 : i64} {
  func.func @node_emb_kernel(%arg0: i32, %arg1: memref<32x128xf32, #tpu.memory_space<vmem>>, %arg2: memref<32x256xf32, #tpu.memory_space<vmem>>, %arg3: memref<128x256xbf16, #tpu.memory_space<vmem>>, %arg4: memref<1x256xf32, #tpu.memory_space<vmem>>, %arg5: memref<256x256xbf16, #tpu.memory_space<vmem>>, %arg6: memref<1x256xf32, #tpu.memory_space<vmem>>, %arg7: memref<256x256xbf16, #tpu.memory_space<vmem>>, %arg8: memref<1x256xf32, #tpu.memory_space<vmem>>, %arg9: memref<256x256xbf16, #tpu.memory_space<vmem>>, %arg10: memref<1x256xf32, #tpu.memory_space<vmem>>, %arg11: memref<32x256xbf16, #tpu.memory_space<vmem>>, %arg12: memref<32x256xbf16, #tpu.memory_space<vmem>>) attributes {dimension_semantics = [#tpu.dimension_semantics<parallel>], iteration_bounds = array<i64: 1>, scalar_prefetch = 0 : i64, scratch_operands = 0 : i64, tpu.core_type = #tpu.core_type<tc>, window_params = [{transform_indices = @transform_0, window_bounds = array<i64: 32, 128>}, {transform_indices = @transform_1, window_bounds = array<i64: 32, 256>}, {pipeline_mode = #tpu.pipeline_mode<synchronous>, transform_indices = @transform_2, window_bounds = array<i64: 128, 256>}, {pipeline_mode = #tpu.pipeline_mode<synchronous>, transform_indices = @transform_3, window_bounds = array<i64: 1, 256>}, {pipeline_mode = #tpu.pipeline_mode<synchronous>, transform_indices = @transform_4, window_bounds = array<i64: 256, 256>}, {pipeline_mode = #tpu.pipeline_mode<synchronous>, transform_indices = @transform_5, window_bounds = array<i64: 1, 256>}, {pipeline_mode = #tpu.pipeline_mode<synchronous>, transform_indices = @transform_6, window_bounds = array<i64: 256, 256>}, {pipeline_mode = #tpu.pipeline_mode<synchronous>, transform_indices = @transform_7, window_bounds = array<i64: 1, 256>}, {pipeline_mode = #tpu.pipeline_mode<synchronous>, transform_indices = @transform_8, window_bounds = array<i64: 256, 256>}, {pipeline_mode = #tpu.pipeline_mode<synchronous>, transform_indices = @transform_9, window_bounds = array<i64: 1, 256>}, {transform_indices = @transform_10, window_bounds = array<i64: 32, 256>}, {transform_indices = @transform_11, window_bounds = array<i64: 32, 256>}]} {
    %c0 = arith.constant 0 : index
    %c0_0 = arith.constant 0 : index
    %0 = vector.load %arg1[%c0, %c0_0] : memref<32x128xf32, #tpu.memory_space<vmem>>, vector<32x128xf32>
    %c0_1 = arith.constant 0 : index
    %c0_2 = arith.constant 0 : index
    %1 = vector.load %arg2[%c0_1, %c0_2] : memref<32x256xf32, #tpu.memory_space<vmem>>, vector<32x256xf32>
    %c0_3 = arith.constant 0 : index
    %c0_4 = arith.constant 0 : index
    %2 = vector.load %arg3[%c0_3, %c0_4] : memref<128x256xbf16, #tpu.memory_space<vmem>>, vector<128x256xbf16>
    %c0_5 = arith.constant 0 : index
    %c0_6 = arith.constant 0 : index
    %3 = vector.load %arg5[%c0_5, %c0_6] : memref<256x256xbf16, #tpu.memory_space<vmem>>, vector<256x256xbf16>
    %c0_7 = arith.constant 0 : index
    %c0_8 = arith.constant 0 : index
    %4 = vector.load %arg7[%c0_7, %c0_8] : memref<256x256xbf16, #tpu.memory_space<vmem>>, vector<256x256xbf16>
    %c0_9 = arith.constant 0 : index
    %c0_10 = arith.constant 0 : index
    %5 = vector.load %arg9[%c0_9, %c0_10] : memref<256x256xbf16, #tpu.memory_space<vmem>>, vector<256x256xbf16>
    %6 = arith.truncf %0 : vector<32x128xf32> to vector<32x128xbf16>
    %cst = arith.constant dense<0.000000e+00> : vector<32x256xf32>
    %7 = tpu.matmul %6, %2, %cst {dimension_numbers = #tpu.dot_dimension_numbers<[1], [0], [0], [1], [0, 0, 1, 1], [], []>} : vector<32x128xbf16>, vector<128x256xbf16>, vector<32x256xf32> -> vector<32x256xf32>
    %c0_11 = arith.constant 0 : index
    %c0_12 = arith.constant 0 : index
    %8 = vector.load %arg4[%c0_11, %c0_12] : memref<1x256xf32, #tpu.memory_space<vmem>>, vector<1x256xf32>
    %9 = vector.broadcast %8 : vector<1x256xf32> to vector<32x256xf32>
    %10 = arith.addf %7, %9 : vector<32x256xf32>
    %11 = vector.extract_strided_slice %10 {offsets = [0, 0], sizes = [32, 128], strides = [1, 1]} : vector<32x256xf32> to vector<32x128xf32>
    %12 = arith.addf %11, %0 : vector<32x128xf32>
    %13 = vector.extract_strided_slice %10 {offsets = [0, 128], sizes = [32, 128], strides = [1, 1]} : vector<32x256xf32> to vector<32x128xf32>
    %14 = tpu.concatenate %12, %13 in 1 : vector<32x128xf32>, vector<32x128xf32> -> vector<32x256xf32>
    %cst_13 = arith.constant 0.000000e+00 : f32
    %15 = vector.broadcast %cst_13 : f32 to vector<32x256xf32>
    %16 = arith.maximumf %14, %15 : vector<32x256xf32>
    %17 = arith.truncf %16 : vector<32x256xf32> to vector<32x256xbf16>
    %cst_14 = arith.constant dense<0.000000e+00> : vector<32x256xf32>
    %18 = tpu.matmul %17, %3, %cst_14 {dimension_numbers = #tpu.dot_dimension_numbers<[1], [0], [0], [1], [0, 0, 1, 1], [], []>} : vector<32x256xbf16>, vector<256x256xbf16>, vector<32x256xf32> -> vector<32x256xf32>
    %c0_15 = arith.constant 0 : index
    %c0_16 = arith.constant 0 : index
    %19 = vector.load %arg6[%c0_15, %c0_16] : memref<1x256xf32, #tpu.memory_space<vmem>>, vector<1x256xf32>
    %20 = vector.broadcast %19 : vector<1x256xf32> to vector<32x256xf32>
    %21 = arith.addf %18, %20 : vector<32x256xf32>
    %22 = arith.addf %21, %16 : vector<32x256xf32>
    %cst_17 = arith.constant 0.000000e+00 : f32
    %23 = vector.broadcast %cst_17 : f32 to vector<32x256xf32>
    %24 = arith.maximumf %22, %23 : vector<32x256xf32>
    %25 = arith.truncf %24 : vector<32x256xf32> to vector<32x256xbf16>
    %c0_18 = arith.constant 0 : index
    %c0_19 = arith.constant 0 : index
    %26 = vector.load %arg11[%c0_18, %c0_19] : memref<32x256xbf16, #tpu.memory_space<vmem>>, vector<32x256xbf16>
    tpu.vector_store %arg11[%c0_18, %c0_19], %25 {strides = array<i32>} : memref<32x256xbf16, #tpu.memory_space<vmem>>, vector<32x256xbf16>,
    %27 = arith.truncf %1 : vector<32x256xf32> to vector<32x256xbf16>
    %cst_20 = arith.constant dense<0.000000e+00> : vector<32x256xf32>
    %28 = tpu.matmul %27, %4, %cst_20 {dimension_numbers = #tpu.dot_dimension_numbers<[1], [0], [0], [1], [0, 0, 1, 1], [], []>} : vector<32x256xbf16>, vector<256x256xbf16>, vector<32x256xf32> -> vector<32x256xf32>
    %c0_21 = arith.constant 0 : index
    %c0_22 = arith.constant 0 : index
    %29 = vector.load %arg8[%c0_21, %c0_22] : memref<1x256xf32, #tpu.memory_space<vmem>>, vector<1x256xf32>
    %30 = vector.broadcast %29 : vector<1x256xf32> to vector<32x256xf32>
    %31 = arith.addf %28, %30 : vector<32x256xf32>
    %32 = arith.addf %31, %1 : vector<32x256xf32>
    %cst_23 = arith.constant 0.000000e+00 : f32
    %33 = vector.broadcast %cst_23 : f32 to vector<32x256xf32>
    %34 = arith.maximumf %32, %33 : vector<32x256xf32>
    %35 = arith.truncf %34 : vector<32x256xf32> to vector<32x256xbf16>
    %cst_24 = arith.constant dense<0.000000e+00> : vector<32x256xf32>
    %36 = tpu.matmul %35, %5, %cst_24 {dimension_numbers = #tpu.dot_dimension_numbers<[1], [0], [0], [1], [0, 0, 1, 1], [], []>} : vector<32x256xbf16>, vector<256x256xbf16>, vector<32x256xf32> -> vector<32x256xf32>
    %c0_25 = arith.constant 0 : index
    %c0_26 = arith.constant 0 : index
    %37 = vector.load %arg10[%c0_25, %c0_26] : memref<1x256xf32, #tpu.memory_space<vmem>>, vector<1x256xf32>
    %38 = vector.broadcast %37 : vector<1x256xf32> to vector<32x256xf32>
    %39 = arith.addf %36, %38 : vector<32x256xf32>
    %40 = arith.addf %39, %34 : vector<32x256xf32>
    %cst_27 = arith.constant 0.000000e+00 : f32
    %41 = vector.broadcast %cst_27 : f32 to vector<32x256xf32>
    %42 = arith.maximumf %40, %41 : vector<32x256xf32>
    %43 = arith.truncf %42 : vector<32x256xf32> to vector<32x256xbf16>
    %c0_28 = arith.constant 0 : index
    %c0_29 = arith.constant 0 : index
    %44 = vector.load %arg12[%c0_28, %c0_29] : memref<32x256xbf16, #tpu.memory_space<vmem>>, vector<32x256xbf16>
    tpu.vector_store %arg12[%c0_28, %c0_29], %43 {strides = array<i32>} : memref<32x256xbf16, #tpu.memory_space<vmem>>, vector<32x256xbf16>,
    return
  }
  func.func @transform_0(%arg0: i32) -> (i32, i32) {
    %c0_i32 = arith.constant 0 : i32
    %c0_i32_0 = arith.constant 0 : i32
    return %arg0, %c0_i32 : i32, i32
  }
  func.func @transform_1(%arg0: i32) -> (i32, i32) {
    %c0_i32 = arith.constant 0 : i32
    %c0_i32_0 = arith.constant 0 : i32
    return %arg0, %c0_i32 : i32, i32
  }
  func.func @transform_2(%arg0: i32) -> (i32, i32) {
    %c0_i32 = arith.constant 0 : i32
    %c0_i32_0 = arith.constant 0 : i32
    %c0_i32_1 = arith.constant 0 : i32
    return %c0_i32, %c0_i32_0 : i32, i32
  }
  func.func @transform_3(%arg0: i32) -> (i32, i32) {
    %c0_i32 = arith.constant 0 : i32
    %c0_i32_0 = arith.constant 0 : i32
    %c0_i32_1 = arith.constant 0 : i32
    return %c0_i32, %c0_i32_0 : i32, i32
  }
  func.func @transform_4(%arg0: i32) -> (i32, i32) {
    %c0_i32 = arith.constant 0 : i32
    %c0_i32_0 = arith.constant 0 : i32
    %c0_i32_1 = arith.constant 0 : i32
    return %c0_i32, %c0_i32_0 : i32, i32
  }
  func.func @transform_5(%arg0: i32) -> (i32, i32) {
    %c0_i32 = arith.constant 0 : i32
    %c0_i32_0 = arith.constant 0 : i32
    %c0_i32_1 = arith.constant 0 : i32
    return %c0_i32, %c0_i32_0 : i32, i32
  }
  func.func @transform_6(%arg0: i32) -> (i32, i32) {
    %c0_i32 = arith.constant 0 : i32
    %c0_i32_0 = arith.constant 0 : i32
    %c0_i32_1 = arith.constant 0 : i32
    return %c0_i32, %c0_i32_0 : i32, i32
  }
  func.func @transform_7(%arg0: i32) -> (i32, i32) {
    %c0_i32 = arith.constant 0 : i32
    %c0_i32_0 = arith.constant 0 : i32
    %c0_i32_1 = arith.constant 0 : i32
    return %c0_i32, %c0_i32_0 : i32, i32
  }
  func.func @transform_8(%arg0: i32) -> (i32, i32) {
    %c0_i32 = arith.constant 0 : i32
    %c0_i32_0 = arith.constant 0 : i32
    %c0_i32_1 = arith.constant 0 : i32
    return %c0_i32, %c0_i32_0 : i32, i32
  }
  func.func @transform_9(%arg0: i32) -> (i32, i32) {
    %c0_i32 = arith.constant 0 : i32
    %c0_i32_0 = arith.constant 0 : i32
    %c0_i32_1 = arith.constant 0 : i32
    return %c0_i32, %c0_i32_0 : i32, i32
  }
  func.func @transform_10(%arg0: i32) -> (i32, i32) {
    %c0_i32 = arith.constant 0 : i32
    %c0_i32_0 = arith.constant 0 : i32
    return %arg0, %c0_i32 : i32, i32
  }
  func.func @transform_11(%arg0: i32) -> (i32, i32) {
    %c0_i32 = arith.constant 0 : i32
    %c0_i32_0 = arith.constant 0 : i32
    return %arg0, %c0_i32 : i32, i32
  }
}

module attributes {stable_mosaic.version = 11 : i64} {
  func.func @distance_loss_kernel(%arg0: i32, %arg1: i32, %arg2: memref<32x256xbf16, #tpu.memory_space<vmem>>, %arg3: memref<32x256xbf16, #tpu.memory_space<vmem>>, %arg4: memref<32x1xf32, #tpu.memory_space<vmem>>, %arg5: memref<32x1xf32, #tpu.memory_space<vmem>>, %arg6: memref<32x1xf32, #tpu.memory_space<vmem>>, %arg7: memref<32x1xf32, #tpu.memory_space<vmem>>) attributes {dimension_semantics = [#tpu.dimension_semantics<parallel>, #tpu.dimension_semantics<arbitrary>], iteration_bounds = array<i64: 1, 1>, scalar_prefetch = 0 : i64, scratch_operands = 2 : i64, tpu.core_type = #tpu.core_type<tc>, window_params = [{transform_indices = @transform_0, window_bounds = array<i64: 32, 256>}, {transform_indices = @transform_1, window_bounds = array<i64: 32, 256>}, {transform_indices = @transform_2, window_bounds = array<i64: 32, 1>}, {transform_indices = @transform_3, window_bounds = array<i64: 32, 1>}]} {
    %c0_i32 = arith.constant 0 : i32
    %0 = arith.cmpi eq, %arg1, %c0_i32 : i32
    %1 = arith.extui %0 : i1 to i32
    %c0_i32_0 = arith.constant 0 : i32
    %2 = arith.cmpi ne, %1, %c0_i32_0 : i32
    scf.if %2 {
      %cst_11 = arith.constant 0.000000e+00 : f32
      %25 = vector.broadcast %cst_11 : f32 to vector<32x1xf32>
      %c0_12 = arith.constant 0 : index
      %c0_13 = arith.constant 0 : index
      %26 = vector.load %arg6[%c0_12, %c0_13] : memref<32x1xf32, #tpu.memory_space<vmem>>, vector<32x1xf32>
      tpu.vector_store %arg6[%c0_12, %c0_13], %25 {strides = array<i32>} : memref<32x1xf32, #tpu.memory_space<vmem>>, vector<32x1xf32>,
      %cst_14 = arith.constant 0.000000e+00 : f32
      %27 = vector.broadcast %cst_14 : f32 to vector<32x1xf32>
      %c0_15 = arith.constant 0 : index
      %c0_16 = arith.constant 0 : index
      %28 = vector.load %arg7[%c0_15, %c0_16] : memref<32x1xf32, #tpu.memory_space<vmem>>, vector<32x1xf32>
      tpu.vector_store %arg7[%c0_15, %c0_16], %27 {strides = array<i32>} : memref<32x1xf32, #tpu.memory_space<vmem>>, vector<32x1xf32>,
    } else {
    }
    %c0 = arith.constant 0 : index
    %c0_1 = arith.constant 0 : index
    %3 = vector.load %arg2[%c0, %c0_1] : memref<32x256xbf16, #tpu.memory_space<vmem>>, vector<32x256xbf16>
    %c0_2 = arith.constant 0 : index
    %c0_3 = arith.constant 0 : index
    %4 = vector.load %arg3[%c0_2, %c0_3] : memref<32x256xbf16, #tpu.memory_space<vmem>>, vector<32x256xbf16>
    %cst = arith.constant dense<0.000000e+00> : vector<32x32xf32>
    %5 = tpu.matmul %3, %4, %cst {dimension_numbers = #tpu.dot_dimension_numbers<[1], [1], [0], [0], [0, 0, 1, 0], [], []>} : vector<32x256xbf16>, vector<32x256xbf16>, vector<32x32xf32> -> vector<32x32xf32>
    %cst_4 = arith.constant 0.000000e+00 : f32
    %6 = vector.broadcast %cst_4 : f32 to vector<32x32xf32>
    %7 = arith.maximumf %5, %6 : vector<32x32xf32>
    %8 = math.absf %5 : vector<32x32xf32>
    %cst_5 = arith.constant 0.000000e+00 : f32
    %9 = vector.broadcast %cst_5 : f32 to vector<32x32xf32>
    %10 = arith.subf %9, %8 : vector<32x32xf32>
    %11 = math.exp %10 : vector<32x32xf32>
    %12 = math.log1p %11 : vector<32x32xf32>
    %13 = arith.addf %7, %12 : vector<32x32xf32>
    %cst_6 = arith.constant dense<0.000000e+00> : vector<32xf32>
    %14 = vector.multi_reduction <add>, %13, %cst_6 [1] : vector<32x32xf32> to vector<32xf32>
    %15 = vector.shape_cast %14 : vector<32xf32> to vector<32x1xf32>
    %16 = arith.cmpi ne, %arg0, %arg1 : i32
    %17 = arith.extui %16 : i1 to i32
    %c0_i32_7 = arith.constant 0 : i32
    %18 = arith.cmpi ne, %17, %c0_i32_7 : i32
    scf.if %18 {
      %c0_11 = arith.constant 0 : index
      %c0_12 = arith.constant 0 : index
      %25 = vector.load %arg6[%c0_11, %c0_12] : memref<32x1xf32, #tpu.memory_space<vmem>>, vector<32x1xf32>
      %26 = arith.addf %25, %15 : vector<32x1xf32>
      %c0_13 = arith.constant 0 : index
      %c0_14 = arith.constant 0 : index
      %27 = vector.load %arg6[%c0_13, %c0_14] : memref<32x1xf32, #tpu.memory_space<vmem>>, vector<32x1xf32>
      tpu.vector_store %arg6[%c0_13, %c0_14], %26 {strides = array<i32>} : memref<32x1xf32, #tpu.memory_space<vmem>>, vector<32x1xf32>,
    } else {
    }
    %19 = arith.cmpi eq, %arg0, %arg1 : i32
    %20 = arith.extui %19 : i1 to i32
    %c0_i32_8 = arith.constant 0 : i32
    %21 = arith.cmpi ne, %20, %c0_i32_8 : i32
    scf.if %21 {
      %25 = tpu.iota {dimensions = array<i32: 0>} : vector<32x32xi32>
      %26 = tpu.iota {dimensions = array<i32: 1>} : vector<32x32xi32>
      %27 = arith.cmpi eq, %25, %26 : vector<32x32xi32>
      %cst_11 = arith.constant 0.000000e+00 : f32
      %28 = vector.broadcast %cst_11 : f32 to vector<32x32xf32>
      %29 = arith.select %27, %13, %28 : vector<32x32xi1>, vector<32x32xf32>
      %cst_12 = arith.constant dense<0.000000e+00> : vector<32xf32>
      %30 = vector.multi_reduction <add>, %29, %cst_12 [1] : vector<32x32xf32> to vector<32xf32>
      %31 = vector.shape_cast %30 : vector<32xf32> to vector<32x1xf32>
      %cst_13 = arith.constant 0.000000e+00 : f32
      %32 = vector.broadcast %cst_13 : f32 to vector<32x32xf32>
      %33 = arith.select %27, %5, %32 : vector<32x32xi1>, vector<32x32xf32>
      %cst_14 = arith.constant dense<0.000000e+00> : vector<32xf32>
      %34 = vector.multi_reduction <add>, %33, %cst_14 [1] : vector<32x32xf32> to vector<32xf32>
      %35 = vector.shape_cast %34 : vector<32xf32> to vector<32x1xf32>
      %c0_15 = arith.constant 0 : index
      %c0_16 = arith.constant 0 : index
      %36 = vector.load %arg6[%c0_15, %c0_16] : memref<32x1xf32, #tpu.memory_space<vmem>>, vector<32x1xf32>
      %37 = arith.subf %15, %31 : vector<32x1xf32>
      %38 = arith.addf %36, %37 : vector<32x1xf32>
      %c0_17 = arith.constant 0 : index
      %c0_18 = arith.constant 0 : index
      %39 = vector.load %arg6[%c0_17, %c0_18] : memref<32x1xf32, #tpu.memory_space<vmem>>, vector<32x1xf32>
      tpu.vector_store %arg6[%c0_17, %c0_18], %38 {strides = array<i32>} : memref<32x1xf32, #tpu.memory_space<vmem>>, vector<32x1xf32>,
      %c0_19 = arith.constant 0 : index
      %c0_20 = arith.constant 0 : index
      %40 = vector.load %arg7[%c0_19, %c0_20] : memref<32x1xf32, #tpu.memory_space<vmem>>, vector<32x1xf32>
      %41 = arith.subf %31, %35 : vector<32x1xf32>
      %42 = arith.addf %40, %41 : vector<32x1xf32>
      %c0_21 = arith.constant 0 : index
      %c0_22 = arith.constant 0 : index
      %43 = vector.load %arg7[%c0_21, %c0_22] : memref<32x1xf32, #tpu.memory_space<vmem>>, vector<32x1xf32>
      tpu.vector_store %arg7[%c0_21, %c0_22], %42 {strides = array<i32>} : memref<32x1xf32, #tpu.memory_space<vmem>>, vector<32x1xf32>,
    } else {
    }
    %c0_i32_9 = arith.constant 0 : i32
    %22 = arith.cmpi eq, %arg1, %c0_i32_9 : i32
    %23 = arith.extui %22 : i1 to i32
    %c0_i32_10 = arith.constant 0 : i32
    %24 = arith.cmpi ne, %23, %c0_i32_10 : i32
    scf.if %24 {
      %c0_11 = arith.constant 0 : index
      %c0_12 = arith.constant 0 : index
      %25 = vector.load %arg6[%c0_11, %c0_12] : memref<32x1xf32, #tpu.memory_space<vmem>>, vector<32x1xf32>
      %c0_13 = arith.constant 0 : index
      %c0_14 = arith.constant 0 : index
      %26 = vector.load %arg4[%c0_13, %c0_14] : memref<32x1xf32, #tpu.memory_space<vmem>>, vector<32x1xf32>
      tpu.vector_store %arg4[%c0_13, %c0_14], %25 {strides = array<i32>} : memref<32x1xf32, #tpu.memory_space<vmem>>, vector<32x1xf32>,
      %c0_15 = arith.constant 0 : index
      %c0_16 = arith.constant 0 : index
      %27 = vector.load %arg7[%c0_15, %c0_16] : memref<32x1xf32, #tpu.memory_space<vmem>>, vector<32x1xf32>
      %c0_17 = arith.constant 0 : index
      %c0_18 = arith.constant 0 : index
      %28 = vector.load %arg5[%c0_17, %c0_18] : memref<32x1xf32, #tpu.memory_space<vmem>>, vector<32x1xf32>
      tpu.vector_store %arg5[%c0_17, %c0_18], %27 {strides = array<i32>} : memref<32x1xf32, #tpu.memory_space<vmem>>, vector<32x1xf32>,
    } else {
    }
    return
  }
  func.func @transform_0(%arg0: i32, %arg1: i32) -> (i32, i32) {
    %c0_i32 = arith.constant 0 : i32
    %c0_i32_0 = arith.constant 0 : i32
    return %arg0, %c0_i32 : i32, i32
  }
  func.func @transform_1(%arg0: i32, %arg1: i32) -> (i32, i32) {
    %c0_i32 = arith.constant 0 : i32
    %c0_i32_0 = arith.constant 0 : i32
    return %arg1, %c0_i32 : i32, i32
  }
  func.func @transform_2(%arg0: i32, %arg1: i32) -> (i32, i32) {
    %c0_i32 = arith.constant 0 : i32
    %c0_i32_0 = arith.constant 0 : i32
    return %arg0, %c0_i32 : i32, i32
  }
  func.func @transform_3(%arg0: i32, %arg1: i32) -> (i32, i32) {
    %c0_i32 = arith.constant 0 : i32
    %c0_i32_0 = arith.constant 0 : i32
    return %arg0, %c0_i32 : i32, i32
  }
}

</mosaic_0001>

<bundles_post_ra>
// kernel: mutual_info.3
= control target key start
LH: loop header
LB: loop body
LE: loop exit
PB: predicated region body
PF: predicated region fallthrough
CT: control target
= control target key end

     0   :  { %v218_v8 = vlaneseq  ;;  %vm184_vm1 = vcmask 261120   ;;  %vm18_vm9 = vcmask 7168   ;;  %s519_s1 = inlined_call_operand.vmem [shape: bf16[32,256], index: 1, kind: input, shape index: {}]   ;;  %s520_s0 = inlined_call_operand.vmem [shape: bf16[32,256], index: 0, kind: input, shape index: {}]   ;;  %s521_s2 = inlined_call_operand.vmem [shape: f32[32,1], index: 2, kind: output, shape index: {0}]   ;;  %s522_s3 = inlined_call_operand.vmem [shape: f32[32,1], index: 3, kind: output, shape index: {1}]  }
   0x1   :  { %v335_v0 = vld [vmem:[%s519_s1 + $0x4] ss:$8 sps:$4 sm:$0xff]   ;;  %v337_v1 = vld [vmem:[%s519_s1] ss:$8 sps:$4 sm:$0xff]   ;;  %v338_v2 = vld [vmem:[%s519_s1 + $0x14] ss:$8 sps:$4 sm:$0xff]  }
   0x2   :  { %75 = vmatprep.subr.bf16.mxu0 %v335_v0  ;;  %330 = vmatprep.subr.bf16.mxu1 %v335_v0  ;;  %v343_v3 = vld [vmem:[%s520_s0 + $0x4] ss:$8 sps:$4 sm:$0xff]   ;;  %v346_v4 = vld [vmem:[%s520_s0 + $0x14] ss:$8 sps:$4 sm:$0xff]   ;;  %v340_v5 = vld [vmem:[%s519_s1 + $0x10] ss:$8 sps:$4 sm:$0xff]  }
   0x3   :  { %76 = vmatpush1.bf16.xpose.msra.mxu0 %v337_v1  ;;  %332 = vmatpush1.bf16.xpose.msra.mxu1 %v337_v1  ;;  %v341_v6 = vld [vmem:[%s520_s0] ss:$8 sps:$4 sm:$0xff]   ;;  %v344_v7 = vld [vmem:[%s520_s0 + $0x10] ss:$8 sps:$4 sm:$0xff]   ;;  %v408_v9 = vand.u32 127, %v218_v8  ;;  %v410_v10 = vshrl.u32 %v218_v8, 7 }
   0x4   :  { %77 = vmatprep.subr.bf16.mxu0 %v338_v2  ;;  %331 = vmatprep.subr.bf16.mxu1 %v338_v2 }
   0x5   :  { %107 = vmatprep.mubr.bf16.mxu0 %v343_v3  ;;  %115 = vmatprep.mubr.bf16.mxu1 %v346_v4  ;;  %vm225_vm0 = vcmp.eq.s32.totalorder %v410_v10, %v408_v9  ;;  %v415_v11 = vadd.s32 8, %v410_v10  ;;  %v221_v54 = vadd.s32 16, %v410_v10 }
   0x7   :  { %vm226_vm2 = vcmp.eq.s32.totalorder %v415_v11, %v408_v9  ;;  %vm227_vm7 = vcmp.eq.s32.totalorder %v221_v54, %v408_v9 }
   0xb   :  { %78 = vmatpush1.bf16.xpose.msra.mxu0 %v340_v5  ;;  %333 = vmatpush1.bf16.xpose.msra.mxu1 %v340_v5 }
  0x12   :  { %108 = vmatmul.mubr.bf16.vlgmr.msra.gmra.mrb[0].mxu0 %v341_v6  ;;  %116 = vmatmul.mubr.bf16.vlgmr.msra.gmra.mrb[0].mxu1 %v344_v7 }
  0xe5   :  { %v417_v12 = vpop.f32.mrb[0].mxu0  ;;  %v419_v13 = vpop.f32.mrb[0].mxu1 }
  0xe6   :  { %v128_v14 = vand.u32 2147483647, %v417_v12  ;;  %v130_v15 = vand.u32 2147483647, %v419_v13  ;;  %v111_v16 = vpop.f32.mrb[1].mxu0  ;;  %v119_v17 = vpop.f32.mrb[1].mxu1 }
  0xe7   :  { %v245_v18 = vsel %vm225_vm0, %v417_v12, 0.0  ;;  %v427_v21 = vpop.f32.mrb[2].mxu0  ;;  %v429_v22 = vpop.f32.mrb[2].mxu1  ;;  %v124_v53 = vmax.f32 %v417_v12, 0.0  ;;  %v126_v1 = vmax.f32 %v419_v13, 0.0 }
  0xe8   :  { %v132_v19 = vsub.f32 0.0, %v128_v14  ;;  %v134_v20 = vsub.f32 0.0, %v130_v15  ;;  %v249_v23 = vsel %vm184_vm1, %v245_v18, 0.0  ;;  %v129_v24 = vand.u32 2147483647, %v427_v21  ;;  %v122_v28 = vpop.f32.mrb[3].mxu1 }
  0xe9   :  { %v131_v25 = vand.u32 2147483647, %v429_v22  ;;  %250 = vadd.xlane.f32.xlu0 %v249_v23  ;;  %v114_v29 = vpop.f32.mrb[3].mxu0  ;;  %v246_v32 = vsel %vm226_vm2, %v427_v21, 0.0  ;;  %v125_v2 = vmax.f32 %v427_v21, 0.0  ;;  %v127_v16 = vmax.f32 %v429_v22, 0.0 }
  0xea   :  { %v136_v26 = vmul.f32 1.442695, %v132_v19  ;;  %v140_v27 = vmul.f32 1.442695, %v134_v20  ;;  %v133_v30 = vsub.f32 0.0, %v129_v24  ;;  %v252_v33 = vsel %vm184_vm1, %v246_v32, 0.0 }
  0xeb   :  { %v135_v31 = vsub.f32 0.0, %v131_v25  ;;  %253 = vadd.xlane.f32.xlu1 %v252_v33  ;;  %v222_v28 = vadd.s32 24, %v410_v10  ;;  %v247_v10 = vsel %vm227_vm7, %v419_v13, 0.0 }
  0xec   :  { %347 = vpow2.f32 %v136_v26  ;;  %v138_v34 = vmul.f32 1.442695, %v133_v30 }
  0xed   :  { %349 = vpow2.f32 %v140_v27  ;;  %v142_v35 = vmul.f32 1.442695, %v135_v31  ;;  %vm228_vm8 = vcmp.eq.s32.totalorder %v222_v28, %v408_v9 }
  0xee   :  { %351 = vpow2.f32 %v138_v34  ;;  %v248_v11 = vsel %vm228_vm8, %v429_v22, 0.0 }
  0xef   :  { %353 = vpow2.f32 %v142_v35  ;;  %v255_v35 = vsel %vm184_vm1, %v247_v10, 0.0  ;;  %v258_v9 = vsel %vm184_vm1, %v248_v11, 0.0 }
  0xf6   :  { %v348_v36 = vpop.eup %347 }
  0xf7   :  { %v350_v37 = vpop.eup %349  ;;  %v144_v38 = vadd.f32 1.0, %v348_v36  ;;  %v147_v44 = vmul.f32 -0.5, %v348_v36  ;;  %v150_v49 = vand.u32 2147483647, %v348_v36 }
  0xf8   :  { %v162_v39 = vadd.f32 1.0, %v350_v37  ;;  %v352_v40 = vpop.eup %351  ;;  %v165_v45 = vmul.f32 -0.5, %v350_v37  ;;  %v168_v51 = vand.u32 2147483647, %v350_v37 }
  0xf9   :  { %355 = vlog2.f32 %v144_v38  ;;  %v354_v41 = vpop.eup %353  ;;  %v153_v42 = vadd.f32 1.0, %v352_v40  ;;  %v156_v46 = vmul.f32 -0.5, %v352_v40  ;;  %v148_v47 = vadd.f32 1.0, %v147_v44 }
  0xfa   :  { %357 = vlog2.f32 %v162_v39  ;;  %v171_v43 = vadd.f32 1.0, %v354_v41  ;;  %v174_v48 = vmul.f32 -0.5, %v354_v41  ;;  %v166_v50 = vadd.f32 1.0, %v165_v45 }
  0xfb   :  { %359 = vlog2.f32 %v153_v42  ;;  %v157_v55 = vadd.f32 1.0, %v156_v46  ;;  %v149_v58 = vmul.f32 %v348_v36, %v148_v47  ;;  %v159_v60 = vand.u32 2147483647, %v352_v40 }
  0xfc   :  { %361 = vlog2.f32 %v171_v43  ;;  %v175_v59 = vadd.f32 1.0, %v174_v48  ;;  %vm151_vm3 = vcmp.lt.f32.partialorder %v150_v49, 0.0004427343  ;;  %v167_v62 = vmul.f32 %v350_v37, %v166_v50 }
  0xfd   :  { %v177_v63 = vand.u32 2147483647, %v354_v41  ;;  %vm169_vm4 = vcmp.lt.f32.partialorder %v168_v51, 0.0004427343  ;;  %v158_v8 = vmul.f32 %v352_v40, %v157_v55  ;;  %vm160_vm5 = vcmp.lt.f32.partialorder %v159_v60, 0.0004427343 }
  0xfe   :  { %v176_v15 = vmul.f32 %v354_v41, %v175_v59  ;;  %v363_v36 = vmov 0.0  }
  0xff   :  { %vm178_vm6 = vcmp.lt.f32.partialorder %v177_v63, 0.0004427343  ;;  %19 = vst.msk [vmem:[#allocation2] sm:$0xff] %vm18_vm9, %v363_v36  ;;  %23 = vst.msk [vmem:[#allocation3] sm:$0xff] %vm18_vm9, %v363_v36 }
 0x100   :  { %20 = vst.msk [vmem:[#allocation2 + $0x8] sm:$0xff] %vm18_vm9, %v363_v36  ;;  %21 = vst.msk [vmem:[#allocation2 + $0x10] sm:$0xff] %vm18_vm9, %v363_v36 }
 0x101   :  { %22 = vst.msk [vmem:[#allocation2 + $0x18] sm:$0xff] %vm18_vm9, %v363_v36  ;;  %24 = vst.msk [vmem:[#allocation3 + $0x8] sm:$0xff] %vm18_vm9, %v363_v36 }
 0x102   :  { %25 = vst.msk [vmem:[#allocation3 + $0x10] sm:$0xff] %vm18_vm9, %v363_v36  ;;  %26 = vst.msk [vmem:[#allocation3 + $0x18] sm:$0xff] %vm18_vm9, %v363_v36 }
 0x103   :  { %v356_v52 = vpop.eup %355 }
 0x104   :  { %v358_v56 = vpop.eup %357  ;;  %v146_v57 = vmul.f32 0.6931472, %v356_v52 }
 0x105   :  { %v164_v61 = vmul.f32 0.6931472, %v358_v56  ;;  %v360_v0 = vpop.eup %359 }
 0x106   :  { %v152_v3 = vsel %vm151_vm3, %v149_v58, %v146_v57  ;;  %v362_v4 = vpop.eup %361  ;;  %v155_v7 = vmul.f32 0.6931472, %v360_v0  ;;  %v261_v39 = vld [vmem:[#allocation2] sm:$0xff] }
 0x107   :  { %v180_v5 = vadd.f32 %v152_v3, %v124_v53  ;;  %v170_v6 = vsel %vm169_vm4, %v167_v62, %v164_v61  ;;  %v173_v14 = vmul.f32 0.6931472, %v362_v4  ;;  %v278_v40 = vld [vmem:[#allocation3] sm:$0xff]  ;;  %v263_v47 = vld [vmem:[#allocation2 + $0x10] sm:$0xff]  ;;  %v262_v55 = vld [vmem:[#allocation2 + $0x8] sm:$0xff] }
 0x108   :  { %v182_v12 = vadd.f32 %v170_v6, %v126_v1  ;;  %v161_v18 = vsel %vm160_vm5, %v158_v8, %v155_v7  ;;  %v279_v50 = vld [vmem:[#allocation3 + $0x8] sm:$0xff]  ;;  %v264_v57 = vld [vmem:[#allocation2 + $0x18] sm:$0xff] }
 0x109   :  { %v185_v17 = vsel %vm184_vm1, %v180_v5, 0.0  ;;  %v229_v20 = vsel %vm225_vm0, %v180_v5, 0.0  ;;  %v179_v21 = vsel %vm178_vm6, %v176_v15, %v173_v14  ;;  %v181_v24 = vadd.f32 %v161_v18, %v125_v2  ;;  %v280_v1 = vld [vmem:[#allocation3 + $0x10] sm:$0xff]  ;;  %v281_v3 = vld [vmem:[#allocation3 + $0x18] sm:$0xff] }
 0x10a   :  { %186 = vadd.xlane.f32.xlu0 %v185_v17  ;;  %v191_v19 = vsel %vm184_vm1, %v182_v12, 0.0  ;;  %v183_v23 = vadd.f32 %v179_v21, %v127_v16  ;;  %v233_v25 = vsel %vm184_vm1, %v229_v20, 0.0  ;;  %v231_v27 = vsel %vm227_vm7, %v182_v12, 0.0 }
 0x10b   :  { %192 = vadd.xlane.f32.xlu1 %v191_v19  ;;  %v230_v29 = vsel %vm226_vm2, %v181_v24, 0.0  ;;  %v239_v30 = vsel %vm184_vm1, %v231_v27, 0.0  ;;  %v188_v33 = vsel %vm184_vm1, %v181_v24, 0.0 }
 0x10c   :  { %v194_v26 = vsel %vm184_vm1, %v183_v23, 0.0  ;;  %v236_v31 = vsel %vm184_vm1, %v230_v29, 0.0  ;;  %v232_v32 = vsel %vm228_vm8, %v183_v23, 0.0 }
 0x10d   :  { %v242_v34 = vsel %vm184_vm1, %v232_v32, 0.0 }
 0x10e   :  { %234 = vadd.xlane.f32.xlu0 %v233_v25 }
 0x10f   :  { %195 = vadd.xlane.f32.xlu1 %v194_v26 }
 0x112   :  { %240 = vadd.xlane.f32.xlu0 %v239_v30 }
 0x113   :  { %237 = vadd.xlane.f32.xlu1 %v236_v31 }
 0x116   :  { %189 = vadd.xlane.f32.xlu0 %v188_v33 }
 0x117   :  { %243 = vadd.xlane.f32.xlu1 %v242_v34 }
 0x11a   :  { %256 = vadd.xlane.f32.xlu0 %v255_v35 }
 0x11b   :  { %259 = vadd.xlane.f32.xlu1 %v258_v9 }
 0x176   :  { %v251_v13 = vpop.xlane.xlu0 %250 }
 0x178   :  { %v254_v22 = vpop.xlane.xlu1 %253 }
 0x197   :  { %v187_v37 = vpop.xlane.xlu0 %186 }
 0x198   :  { %v193_v38 = vpop.xlane.xlu1 %192 }
 0x19b   :  { %v235_v41 = vpop.xlane.xlu0 %234 }
 0x19c   :  { %v265_v42 = vsub.f32 %v187_v37, %v235_v41  ;;  %v282_v43 = vsub.f32 %v235_v41, %v251_v13  ;;  %v196_v44 = vpop.xlane.xlu1 %195 }
 0x19e   :  { %v269_v45 = vadd.f32 %v265_v42, %v261_v39  ;;  %v286_v46 = vadd.f32 %v282_v43, %v278_v40 }
 0x19f   :  { %v241_v48 = vpop.xlane.xlu0 %240 }
 0x1a0   :  { %274 = vst.msk [vmem:[#allocation2] sm:$0xff] %vm18_vm9, %v269_v45  ;;  %290 = vst.msk [vmem:[#allocation3] sm:$0xff] %vm18_vm9, %v286_v46  ;;  %v267_v49 = vsub.f32 %v193_v38, %v241_v48  ;;  %v238_v51 = vpop.xlane.xlu1 %237 }
 0x1a1   :  { %v283_v52 = vsub.f32 %v238_v51, %v254_v22 }
 0x1a2   :  { %v271_v53 = vadd.f32 %v267_v49, %v263_v47 }
 0x1a3   :  { %v287_v54 = vadd.f32 %v283_v52, %v279_v50  ;;  %v190_v56 = vpop.xlane.xlu0 %189 }
 0x1a4   :  { %276 = vst.msk [vmem:[#allocation2 + $0x10] sm:$0xff] %vm18_vm9, %v271_v53  ;;  %v244_v58 = vpop.xlane.xlu1 %243  ;;  %v266_v59 = vsub.f32 %v190_v56, %v238_v51 }
 0x1a5   :  { %291 = vst.msk [vmem:[#allocation3 + $0x8] sm:$0xff] %vm18_vm9, %v287_v54  ;;  %v268_v60 = vsub.f32 %v196_v44, %v244_v58 }
 0x1a6   :  { %v270_v61 = vadd.f32 %v266_v59, %v262_v55 }
 0x1a7   :  { %v297_v62 = vld [vmem:[#allocation2] sm:$0xff]  ;;  %v272_v0 = vadd.f32 %v268_v60, %v264_v57  ;;  %v257_v2 = vpop.xlane.xlu0 %256 }
 0x1a8   :  { %v306_v63 = vld [vmem:[#allocation3] sm:$0xff]  ;;  %302 = vst.msk [vmem:[%s521_s2] sm:$0xff] %vm18_vm9, %v297_v62  ;;  %275 = vst.msk [vmem:[#allocation2 + $0x8] sm:$0xff] %vm18_vm9, %v270_v61  ;;  %v260_v4 = vpop.xlane.xlu1 %259  ;;  %v284_v5 = vsub.f32 %v241_v48, %v257_v2 }
 0x1a9   :  { %310 = vst.msk [vmem:[%s522_s3] sm:$0xff] %vm18_vm9, %v306_v63  ;;  %277 = vst.msk [vmem:[#allocation2 + $0x18] sm:$0xff] %vm18_vm9, %v272_v0  ;;  %v285_v6 = vsub.f32 %v244_v58, %v260_v4 }
 0x1aa   :  { %v288_v7 = vadd.f32 %v284_v5, %v280_v1 }
 0x1ab   :  { %v299_v8 = vld [vmem:[#allocation2 + $0x10] sm:$0xff]  ;;  %v289_v12 = vadd.f32 %v285_v6, %v281_v3 }
 0x1ac   :  { %304 = vst.msk [vmem:[%s521_s2 + $0x10] sm:$0xff] %vm18_vm9, %v299_v8  ;;  %v307_v14 = vld [vmem:[#allocation3 + $0x8] sm:$0xff]  ;;  %292 = vst.msk [vmem:[#allocation3 + $0x10] sm:$0xff] %vm18_vm9, %v288_v7 }
 0x1ad   :  { %311 = vst.msk [vmem:[%s522_s3 + $0x8] sm:$0xff] %vm18_vm9, %v307_v14  ;;  %293 = vst.msk [vmem:[#allocation3 + $0x18] sm:$0xff] %vm18_vm9, %v289_v12 }
 0x1af   :  { %v298_v15 = vld [vmem:[#allocation2 + $0x8] sm:$0xff] }
 0x1b0   :  { %v300_v16 = vld [vmem:[#allocation2 + $0x18] sm:$0xff]  ;;  %303 = vst.msk [vmem:[%s521_s2 + $0x8] sm:$0xff] %vm18_vm9, %v298_v15 }
 0x1b1   :  { %305 = vst.msk [vmem:[%s521_s2 + $0x18] sm:$0xff] %vm18_vm9, %v300_v16 }
 0x1b3   :  { %v308_v17 = vld [vmem:[#allocation3 + $0x10] sm:$0xff] }
 0x1b4   :  { %v309_v18 = vld [vmem:[#allocation3 + $0x18] sm:$0xff]  ;;  %312 = vst.msk [vmem:[%s522_s3 + $0x10] sm:$0xff] %vm18_vm9, %v308_v17 }
 0x1b5   :  { %313 = vst.msk [vmem:[%s522_s3 + $0x18] sm:$0xff] %vm18_vm9, %v309_v18 }

// kernel: mutual_info.2
= control target key start
LH: loop header
LB: loop body
LE: loop exit
PB: predicated region body
PF: predicated region fallthrough
CT: control target
= control target key end

     0   :  { %17 = vsyncpa [#allocation3], 0  ;;  %s2019_s0 = inlined_call_operand.hbm [shape: f32[32,128], index: 0, kind: input, shape index: {}]   ;;  %s2020_s1 = inlined_call_operand.hbm [shape: f32[32,256], index: 1, kind: input, shape index: {}]   ;;  %s2021_s2 = inlined_call_operand.hbm [shape: bf16[128,256], index: 2, kind: input, shape index: {}]   ;;  %s2022_s3 = inlined_call_operand.vmem [shape: f32[1,256], index: 3, kind: input, shape index: {}]   ;;  %s2023_s4 = inlined_call_operand.hbm [shape: bf16[256,256], index: 4, kind: input, shape index: {}]   ;;  %s2024_s5 = inlined_call_operand.vmem [shape: f32[1,256], index: 5, kind: input, shape index: {}]   ;;  %s2025_s6 = inlined_call_operand.hbm [shape: bf16[256,256], index: 6, kind: input, shape index: {}]   ;;  %s2026_s7 = inlined_call_operand.vmem [shape: f32[1,256], index: 7, kind: input, shape index: {}]   ;;  %s2027_s8 = inlined_call_operand.hbm [shape: bf16[256,256], index: 8, kind: input, shape index: {}]   ;;  %s2028_s9 = inlined_call_operand.vmem [shape: f32[1,256], index: 9, kind: input, shape index: {}]   ;;  %s2029_s10 = inlined_call_operand.vmem [shape: bf16[32,256], index: 10, kind: output, shape index: {0}]   ;;  %s2030_s11 = inlined_call_operand.vmem [shape: bf16[32,256], index: 11, kind: output, shape index: {1}]  }
   0x1   :  { %18 = vsyncpa [#allocation5], 0 }
   0x2   :  { %19 = vsyncpa [#allocation8], 0 }
   0x3   :  { %20 = vsyncpa [#allocation11], 0  ;;  %s1653_s17 = smov [#allocation4]   ;;  %s1513_s21 = scalar_lea.hbm %s2020_s1, 1024 }
   0x4   :  { %s38_s18 = sshll.u32 %s1653_s17, 4  ;;  %p1514_p0 = scmp.ne.s32.totalorder %s2020_s1, %s1513_s21  ;;  %s39_s18 = int_to_ptr.vmem [resolvable:$true] %s38_s18 }
   0x5   :  { %p1517_p1 = scmp.lt.u32.totalorder %s1513_s21, %s2020_s1 }
   0x7   :  { %p1519_p2 = pnand %p1517_p1, %p1514_p0 }
   0x9   :  { %1522 = shalt.err (!%p1519_p2)
}
   0xa   :  { %s1523_s26 = scalar_lea.vmem %s39_s18, 1024  ;;  %p1528_p4 = scmp.lt.s32.totalorder %s39_s18, %s39_s18 }
   0xb   :  { %p1524_p3 = scmp.ne.s32.totalorder %s39_s18, %s1523_s26  ;;  %p1529_p5 = scmp.lt.s32.totalorder %s1523_s26, %s1523_s26 }
   0xd   :  { %p1530_p6 = por %p1529_p5, %p1528_p4 }
   0xf   :  { %p1531_p7 = pnand %p1530_p6, %p1524_p3 }
  0x11   :  { %1534 = shalt.err (!%p1531_p7)
}
  0x12   :  { %s1654_s27 = smov 256   ;;  %s1655_s28 = smov 16  }
  0x13   :  { %44 = dma.hbm_to_vmem [thread:$0]  %s2020_s1, 1024, %s39_s18, [#allocation5], %s1654_s27, %s1654_s27, %s1655_s28  }
  0x14   :  { %s1656_s12 = smov [#allocation7]   ;;  %s1657_s14 = smov [#allocation2]  }
  0x15   :  { %s64_s13 = sshll.u32 %s1656_s12, 4  ;;  %s26_s15 = sshll.u32 %s1657_s14, 4  ;;  %s65_s13 = int_to_ptr.vmem [resolvable:$true] %s64_s13  ;;  %s27_s15 = int_to_ptr.vmem [resolvable:$true] %s26_s15 }
  0x16   :  { %s1535_s19 = scalar_lea.hbm %s2023_s4, 4096 }
  0x17   :  { %p1536_p8 = scmp.ne.s32.totalorder %s2023_s4, %s1535_s19  ;;  %p1539_p9 = scmp.lt.u32.totalorder %s1535_s19, %s2023_s4 }
  0x19   :  { %p1541_p10 = pnand %p1539_p9, %p1536_p8 }
  0x1b   :  { %1544 = shalt.err (!%p1541_p10)
}
  0x1c   :  { %s1545_s1 = scalar_lea.vmem %s65_s13, 4096  ;;  %p1550_p12 = scmp.lt.s32.totalorder %s65_s13, %s65_s13 }
  0x1d   :  { %p1546_p11 = scmp.ne.s32.totalorder %s65_s13, %s1545_s1  ;;  %p1551_p13 = scmp.lt.s32.totalorder %s1545_s1, %s1545_s1 }
  0x1f   :  { %p1552_p0 = por %p1551_p13, %p1550_p12 }
  0x21   :  { %p1553_p1 = pnand %p1552_p0, %p1546_p11 }
  0x23   :  { %1556 = shalt.err (!%p1553_p1)
}
  0x24   :  { %s1658_s18 = smov 128   ;;  %s1659_s24 = smov 8  }
  0x25   :  { %70 = dma.hbm_to_vmem [thread:$0]  %s2023_s4, 4096, %s65_s13, [#allocation8], %s1658_s18, %s1658_s18, %s1659_s24  }
  0x26   :  { %s1557_s29 = scalar_lea.hbm %s2019_s0, 512 }
  0x27   :  { %p1558_p2 = scmp.ne.s32.totalorder %s2019_s0, %s1557_s29  ;;  %p1561_p3 = scmp.lt.u32.totalorder %s1557_s29, %s2019_s0 }
  0x29   :  { %p1563_p4 = pnand %p1561_p3, %p1558_p2 }
  0x2b   :  { %1566 = shalt.err (!%p1563_p4)
}
  0x2c   :  { %s1567_s17 = scalar_lea.vmem %s27_s15, 512  ;;  %p1572_p6 = scmp.lt.s32.totalorder %s27_s15, %s27_s15 }
  0x2d   :  { %p1568_p5 = scmp.ne.s32.totalorder %s27_s15, %s1567_s17  ;;  %p1573_p7 = scmp.lt.s32.totalorder %s1567_s17, %s1567_s17 }
  0x2f   :  { %p1574_p8 = por %p1573_p7, %p1572_p6 }
  0x31   :  { %p1575_p9 = pnand %p1574_p8, %p1568_p5 }
  0x33   :  { %1578 = shalt.err (!%p1575_p9)
}
  0x34   :  { %32 = dma.hbm_to_vmem [thread:$0]  %s2019_s0, 512, %s27_s15, [#allocation3], %s1658_s18, %s1658_s18, %s1659_s24  }
  0x35   :  { %s1660_s19 = smov [#allocation6]   ;;  %s1661_s21 = smov [#allocation9]  }
  0x36   :  { %s50_s20 = sshll.u32 %s1660_s19, 4  ;;  %s78_s22 = sshll.u32 %s1661_s21, 4  ;;  %s51_s20 = int_to_ptr.vmem [resolvable:$true] %s50_s20  ;;  %s79_s22 = int_to_ptr.vmem [resolvable:$true] %s78_s22 }
  0x37   :  { %s1579_s25 = scalar_lea.hbm %s2021_s2, 2048 }
  0x38   :  { %p1580_p10 = scmp.ne.s32.totalorder %s2021_s2, %s1579_s25  ;;  %p1583_p11 = scmp.lt.u32.totalorder %s1579_s25, %s2021_s2 }
  0x3a   :  { %p1585_p12 = pnand %p1583_p11, %p1580_p10 }
  0x3c   :  { %1588 = shalt.err (!%p1585_p12)
}
  0x3d   :  { %s1589_s0 = scalar_lea.vmem %s51_s20, 2048  ;;  %p1594_p0 = scmp.lt.s32.totalorder %s51_s20, %s51_s20 }
  0x3e   :  { %p1590_p13 = scmp.ne.s32.totalorder %s51_s20, %s1589_s0  ;;  %p1595_p1 = scmp.lt.s32.totalorder %s1589_s0, %s1589_s0 }
  0x40   :  { %p1596_p2 = por %p1595_p1, %p1594_p0 }
  0x42   :  { %p1597_p3 = pnand %p1596_p2, %p1590_p13 }
  0x44   :  { %1600 = shalt.err (!%p1597_p3)
}
  0x45   :  { %56 = dma.hbm_to_vmem [thread:$0]  %s2021_s2, 2048, %s51_s20, [#allocation5], %s1658_s18, %s1658_s18, %s1659_s24  }
  0x46   :  { %s1601_s16 = scalar_lea.hbm %s2025_s6, 4096 }
  0x47   :  { %p1602_p4 = scmp.ne.s32.totalorder %s2025_s6, %s1601_s16  ;;  %p1605_p5 = scmp.lt.u32.totalorder %s1601_s16, %s2025_s6 }
  0x49   :  { %p1607_p6 = pnand %p1605_p5, %p1602_p4 }
  0x4b   :  { %1610 = shalt.err (!%p1607_p6)
}
  0x4c   :  { %s1611_s21 = scalar_lea.vmem %s79_s22, 4096  ;;  %p1616_p8 = scmp.lt.s32.totalorder %s79_s22, %s79_s22 }
  0x4d   :  { %p1612_p7 = scmp.ne.s32.totalorder %s79_s22, %s1611_s21  ;;  %p1617_p9 = scmp.lt.s32.totalorder %s1611_s21, %s1611_s21 }
  0x4f   :  { %p1618_p10 = por %p1617_p9, %p1616_p8 }
  0x51   :  { %p1619_p11 = pnand %p1618_p10, %p1612_p7 }
  0x53   :  { %1622 = shalt.err (!%p1619_p11)
}
  0x54   :  { %84 = dma.hbm_to_vmem [thread:$0]  %s2025_s6, 4096, %s79_s22, [#allocation8], %s1658_s18, %s1658_s18, %s1659_s24  }
  0x55   :  { %s1662_s23 = smov [#allocation10]   ;;  %s1623_s27 = scalar_lea.hbm %s2027_s8, 4096 }
  0x56   :  { %s92_s1 = sshll.u32 %s1662_s23, 4  ;;  %p1624_p12 = scmp.ne.s32.totalorder %s2027_s8, %s1623_s27  ;;  %s93_s1 = int_to_ptr.vmem [resolvable:$true] %s92_s1 }
  0x57   :  { %p1627_p13 = scmp.lt.u32.totalorder %s1623_s27, %s2027_s8 }
  0x59   :  { %p1629_p0 = pnand %p1627_p13, %p1624_p12 }
  0x5b   :  { %1632 = shalt.err (!%p1629_p0)
}
  0x5c   :  { %s1633_s30 = scalar_lea.vmem %s93_s1, 4096  ;;  %p1638_p2 = scmp.lt.s32.totalorder %s93_s1, %s93_s1 }
  0x5d   :  { %p1634_p1 = scmp.ne.s32.totalorder %s93_s1, %s1633_s30  ;;  %p1639_p3 = scmp.lt.s32.totalorder %s1633_s30, %s1633_s30 }
  0x5f   :  { %p1640_p4 = por %p1639_p3, %p1638_p2 }
  0x61   :  { %p1641_p5 = pnand %p1640_p4, %p1634_p1 }
  0x63   :  { %1644 = shalt.err (!%p1641_p5)
}
  0x64   :  { %98 = dma.hbm_to_vmem [thread:$0]  %s2027_s8, 4096, %s93_s1, [#allocation11], %s1658_s18, %s1658_s18, %s1659_s24  }
  0x65   :  { %1645 = dma.done.wait [#allocation3], 512  }
  0x66   :  { %1646 = vsyncadd [#allocation3], 4294966784 }
  0x67   :  { %1647 = dma.done.wait [#allocation5], 3072  }
  0x68   :  { %1648 = vsyncadd [#allocation5], 4294964224 }
  0x69   :  { %1649 = dma.done.wait [#allocation8], 8192  }
  0x6a   :  { %1650 = vsyncadd [#allocation8], 4294959104 }
  0x6b   :  { %1651 = dma.done.wait [#allocation11], 4096  }
  0x6c   :  { %1652 = vsyncadd [#allocation11], 4294963200  ;;  %v1663_v0 = vmov 0   ;;  %v1345_v1 = vld [vmem:[#allocation6 + $0x4] ss:$8 sps:$4 sm:$0xff]   ;;  %v1817_v24 = vld [vmem:[#allocation2 + $0x10] sm:$0xff] }
  0x6d   :  { %370 = vmatprep.mubr.bf16.mxu0 %v1663_v0  ;;  %v1347_v2 = vld [vmem:[#allocation6] ss:$8 sps:$4 sm:$0xff]   ;;  %338 = vmatprep.subr.bf16.mxu0 %v1345_v1  ;;  %v1348_v3 = vld [vmem:[#allocation6 + $0x14] ss:$8 sps:$4 sm:$0xff]   ;;  %v1350_v4 = vld [vmem:[#allocation6 + $0x10] ss:$8 sps:$4 sm:$0xff]  }
  0x6e   :  { %339 = vmatpush1.bf16.msra.mxu0 %v1347_v2  ;;  %v1351_v5 = vld [vmem:[#allocation6 + $0x24] ss:$8 sps:$4 sm:$0xff]   ;;  %v1353_v6 = vld [vmem:[#allocation6 + $0x20] ss:$8 sps:$4 sm:$0xff]   ;;  %v1354_v7 = vld [vmem:[#allocation6 + $0x34] ss:$8 sps:$4 sm:$0xff]  }
  0x6f   :  { %340 = vmatprep.subr.bf16.mxu0 %v1348_v3  ;;  %v1356_v8 = vld [vmem:[#allocation6 + $0x30] ss:$8 sps:$4 sm:$0xff]   ;;  %v1357_v9 = vld [vmem:[#allocation6 + $0x44] ss:$8 sps:$4 sm:$0xff]   ;;  %v1359_v10 = vld [vmem:[#allocation6 + $0x40] ss:$8 sps:$4 sm:$0xff]  }
  0x70   :  { %v1360_v11 = vld [vmem:[#allocation6 + $0x54] ss:$8 sps:$4 sm:$0xff]   ;;  %v1362_v12 = vld [vmem:[#allocation6 + $0x50] ss:$8 sps:$4 sm:$0xff]   ;;  %v1363_v13 = vld [vmem:[#allocation6 + $0x64] ss:$8 sps:$4 sm:$0xff]  }
  0x71   :  { %v1365_v14 = vld [vmem:[#allocation6 + $0x60] ss:$8 sps:$4 sm:$0xff]   ;;  %v1366_v15 = vld [vmem:[#allocation6 + $0x74] ss:$8 sps:$4 sm:$0xff]   ;;  %v1368_v16 = vld [vmem:[#allocation6 + $0x70] ss:$8 sps:$4 sm:$0xff]  }
  0x72   :  { %341 = vmatpush1.bf16.msra.mxu0 %v1350_v4  ;;  %v1811_v17 = vld [vmem:[#allocation2] sm:$0xff]  ;;  %v1813_v18 = vld [vmem:[#allocation2 + $0x8] sm:$0xff]  ;;  %v1374_v22 = vld [vmem:[#allocation9 + $0x14] ss:$8 sps:$4 sm:$0xff]  }
  0x73   :  { %342 = vmatprep.subr.bf16.mxu0 %v1351_v5  ;;  %v1371_v19 = vld [vmem:[#allocation9 + $0x4] ss:$8 sps:$4 sm:$0xff]   ;;  %v244_v20 = vpack.c.bf16 %v1813_v18, %v1811_v17  ;;  %v1369_v21 = vld [vmem:[#allocation9] ss:$8 sps:$4 sm:$0xff]   ;;  %v1372_v23 = vld [vmem:[#allocation9 + $0x10] ss:$8 sps:$4 sm:$0xff]  }
  0x74   :  { %v1819_v25 = vld [vmem:[#allocation2 + $0x18] sm:$0xff]  ;;  %v1377_v26 = vld [vmem:[#allocation9 + $0x24] ss:$8 sps:$4 sm:$0xff]   ;;  %v1419_v30 = vld [vmem:[#allocation7] ss:$8 sps:$4 sm:$0xff]  }
  0x75   :  { %v1821_v27 = vld [vmem:[#allocation4 + $0x8] sm:$0xff]  ;;  %v1823_v28 = vld [vmem:[#allocation4 + $0x18] sm:$0xff]  ;;  %v245_v31 = vpack.c.bf16 %v1819_v25, %v1817_v24 }
  0x76   :  { %343 = vmatpush1.bf16.msra.mxu0 %v1353_v6  ;;  %v1417_v29 = vld [vmem:[#allocation7 + $0x4] ss:$8 sps:$4 sm:$0xff]   ;;  %v1420_v32 = vld [vmem:[#allocation7 + $0x14] ss:$8 sps:$4 sm:$0xff]   ;;  %v1375_v33 = vld [vmem:[#allocation9 + $0x20] ss:$8 sps:$4 sm:$0xff]   ;;  %v677_v35 = vpack.c.bf16 %v1823_v28, %v1821_v27 }
  0x77   :  { %344 = vmatprep.subr.bf16.mxu0 %v1354_v7  ;;  %579 = vmatprep.subr.bf16.mxu1 %v1417_v29  ;;  %v1380_v34 = vld [vmem:[#allocation9 + $0x34] ss:$8 sps:$4 sm:$0xff]   ;;  %v1422_v36 = vld [vmem:[#allocation7 + $0x10] ss:$8 sps:$4 sm:$0xff]   ;;  %v1423_v37 = vld [vmem:[#allocation7 + $0x24] ss:$8 sps:$4 sm:$0xff]  }
  0x78   :  { %580 = vmatpush1.bf16.msra.mxu1 %v1419_v30  ;;  %v1378_v38 = vld [vmem:[#allocation9 + $0x30] ss:$8 sps:$4 sm:$0xff]   ;;  %v1383_v39 = vld [vmem:[#allocation9 + $0x44] ss:$8 sps:$4 sm:$0xff]   ;;  %v1425_v40 = vld [vmem:[#allocation7 + $0x20] ss:$8 sps:$4 sm:$0xff]  }
  0x79   :  { %581 = vmatprep.subr.bf16.mxu1 %v1420_v32  ;;  %v1426_v41 = vld [vmem:[#allocation7 + $0x34] ss:$8 sps:$4 sm:$0xff]   ;;  %v1381_v42 = vld [vmem:[#allocation9 + $0x40] ss:$8 sps:$4 sm:$0xff]   ;;  %v1428_v44 = vld [vmem:[#allocation7 + $0x30] ss:$8 sps:$4 sm:$0xff]  }
  0x7a   :  { %345 = vmatpush1.bf16.msra.mxu0 %v1356_v8  ;;  %v1386_v43 = vld [vmem:[#allocation9 + $0x54] ss:$8 sps:$4 sm:$0xff]   ;;  %v1429_v45 = vld [vmem:[#allocation7 + $0x44] ss:$8 sps:$4 sm:$0xff]   ;;  %v1384_v46 = vld [vmem:[#allocation9 + $0x50] ss:$8 sps:$4 sm:$0xff]  }
  0x7b   :  { %346 = vmatprep.subr.bf16.mxu0 %v1357_v9  ;;  %v1389_v47 = vld [vmem:[#allocation9 + $0x64] ss:$8 sps:$4 sm:$0xff]   ;;  %v1431_v48 = vld [vmem:[#allocation7 + $0x40] ss:$8 sps:$4 sm:$0xff]   ;;  %v1432_v50 = vld [vmem:[#allocation7 + $0x54] ss:$8 sps:$4 sm:$0xff]  }
  0x7c   :  { %582 = vmatpush1.bf16.msra.mxu1 %v1422_v36  ;;  %v1387_v49 = vld [vmem:[#allocation9 + $0x60] ss:$8 sps:$4 sm:$0xff]   ;;  %v1392_v51 = vld [vmem:[#allocation9 + $0x74] ss:$8 sps:$4 sm:$0xff]   ;;  %v1434_v52 = vld [vmem:[#allocation7 + $0x50] ss:$8 sps:$4 sm:$0xff]  }
  0x7d   :  { %583 = vmatprep.subr.bf16.mxu1 %v1423_v37  ;;  %v1435_v53 = vld [vmem:[#allocation7 + $0x64] ss:$8 sps:$4 sm:$0xff]   ;;  %v1390_v54 = vld [vmem:[#allocation9 + $0x70] ss:$8 sps:$4 sm:$0xff]   ;;  %v1437_v56 = vld [vmem:[#allocation7 + $0x60] ss:$8 sps:$4 sm:$0xff]  }
  0x7e   :  { %347 = vmatpush1.bf16.msra.mxu0 %v1359_v10  ;;  %v1395_v55 = vld [vmem:[#allocation9 + $0x84] ss:$8 sps:$4 sm:$0xff]   ;;  %v1438_v57 = vld [vmem:[#allocation7 + $0x74] ss:$8 sps:$4 sm:$0xff]   ;;  %v1393_v58 = vld [vmem:[#allocation9 + $0x80] ss:$8 sps:$4 sm:$0xff]  }
  0x7f   :  { %348 = vmatprep.subr.bf16.mxu0 %v1360_v11  ;;  %v1398_v59 = vld [vmem:[#allocation9 + $0x94] ss:$8 sps:$4 sm:$0xff]   ;;  %v1440_v60 = vld [vmem:[#allocation7 + $0x70] ss:$8 sps:$4 sm:$0xff]   ;;  %v1441_v61 = vld [vmem:[#allocation7 + $0x84] ss:$8 sps:$4 sm:$0xff]  }
  0x80   :  { %584 = vmatpush1.bf16.msra.mxu1 %v1425_v40  ;;  %v1396_v62 = vld [vmem:[#allocation9 + $0x90] ss:$8 sps:$4 sm:$0xff]   ;;  %v1401_v63 = vld [vmem:[#allocation9 + $0xa4] ss:$8 sps:$4 sm:$0xff]   ;;  %v1444_v1 = vld [vmem:[#allocation7 + $0x94] ss:$8 sps:$4 sm:$0xff]  }
  0x81   :  { %585 = vmatprep.subr.bf16.mxu1 %v1426_v41  ;;  %v1399_v2 = vld [vmem:[#allocation9 + $0xa0] ss:$8 sps:$4 sm:$0xff]   ;;  %v1404_v3 = vld [vmem:[#allocation9 + $0xb4] ss:$8 sps:$4 sm:$0xff]   ;;  %v1446_v4 = vld [vmem:[#allocation7 + $0x90] ss:$8 sps:$4 sm:$0xff]  }
  0x82   :  { %349 = vmatpush1.bf16.msra.mxu0 %v1362_v12  ;;  %v1447_v5 = vld [vmem:[#allocation7 + $0xa4] ss:$8 sps:$4 sm:$0xff]   ;;  %v1402_v6 = vld [vmem:[#allocation9 + $0xb0] ss:$8 sps:$4 sm:$0xff]   ;;  %v1449_v8 = vld [vmem:[#allocation7 + $0xa0] ss:$8 sps:$4 sm:$0xff]  }
  0x83   :  { %350 = vmatprep.subr.bf16.mxu0 %v1363_v13  ;;  %v1407_v7 = vld [vmem:[#allocation9 + $0xc4] ss:$8 sps:$4 sm:$0xff]   ;;  %v1450_v9 = vld [vmem:[#allocation7 + $0xb4] ss:$8 sps:$4 sm:$0xff]   ;;  %v1405_v10 = vld [vmem:[#allocation9 + $0xc0] ss:$8 sps:$4 sm:$0xff]  }
  0x84   :  { %586 = vmatpush1.bf16.msra.mxu1 %v1428_v44  ;;  %v1410_v11 = vld [vmem:[#allocation9 + $0xd4] ss:$8 sps:$4 sm:$0xff]   ;;  %v1452_v12 = vld [vmem:[#allocation7 + $0xb0] ss:$8 sps:$4 sm:$0xff]   ;;  %v1453_v13 = vld [vmem:[#allocation7 + $0xc4] ss:$8 sps:$4 sm:$0xff]  }
  0x85   :  { %587 = vmatprep.subr.bf16.mxu1 %v1429_v45  ;;  %v1833_v29 = vld [vmem:[#allocation4 + $0x28] sm:$0xff]  ;;  %v1835_v30 = vld [vmem:[#allocation4 + $0x38] sm:$0xff]  ;;  %v246_v45 = vld [vmem:[%s2022_s3] sm:$0x3] }
  0x86   :  { %351 = vmatpush1.bf16.msra.mxu0 %v1365_v14  ;;  %v1408_v14 = vld [vmem:[#allocation9 + $0xd0] ss:$8 sps:$4 sm:$0xff]   ;;  %v679_v32 = vpack.c.bf16 %v1835_v30, %v1833_v29  ;;  %v1459_v37 = vld [vmem:[#allocation7 + $0xe4] ss:$8 sps:$4 sm:$0xff]  }
  0x87   :  { %352 = vmatprep.subr.bf16.mxu0 %v1366_v15  ;;  %v1413_v15 = vld [vmem:[#allocation9 + $0xe4] ss:$8 sps:$4 sm:$0xff]   ;;  %v1458_v36 = vld [vmem:[#allocation7 + $0xd0] ss:$8 sps:$4 sm:$0xff]  }
  0x88   :  { %588 = vmatpush1.bf16.msra.mxu1 %v1431_v48  ;;  %v1464_v40 = vld [vmem:[#allocation7 + $0xf0] ss:$8 sps:$4 sm:$0xff]   ;;  %v1467_v41 = vld [vmem:[#allocation10 + $0x4] ss:$8 sps:$4 sm:$0xff]  }
  0x89   :  { %589 = vmatprep.subr.bf16.mxu1 %v1432_v50 }
  0x8a   :  { %353 = vmatpush1.bf16.msra.mxu0 %v1368_v16  ;;  %v1455_v16 = vld [vmem:[#allocation7 + $0xc0] ss:$8 sps:$4 sm:$0xff]  }
  0x8b   :  { %852 = vmatprep.subr.bf16.mxu0 %v1371_v19  ;;  %v1456_v19 = vld [vmem:[#allocation7 + $0xd4] ss:$8 sps:$4 sm:$0xff]  }
  0x8c   :  { %590 = vmatpush1.bf16.msra.mxu1 %v1434_v52 }
  0x8d   :  { %371 = vmatmul.mubr.bf16.vlgmr.msra.gmra.mrb[0].mxu0 %v244_v20  ;;  %591 = vmatprep.subr.bf16.mxu1 %v1435_v53  ;;  %v1411_v20 = vld [vmem:[#allocation9 + $0xe0] ss:$8 sps:$4 sm:$0xff]  }
  0x8e   :  { %853 = vmatpush1.bf16.msra.mxu0 %v1369_v21  ;;  %380 = vmatprep.mubr.bf16.mxu0 %v1663_v0  ;;  %v1443_v0 = vld [vmem:[#allocation7 + $0x80] ss:$8 sps:$4 sm:$0xff]   ;;  %v1416_v21 = vld [vmem:[#allocation9 + $0xf4] ss:$8 sps:$4 sm:$0xff]  }
  0x8f   :  { %854 = vmatprep.subr.bf16.mxu0 %v1374_v22  ;;  %v1414_v22 = vld [vmem:[#allocation9 + $0xf0] ss:$8 sps:$4 sm:$0xff]  }
  0x90   :  { %592 = vmatpush1.bf16.msra.mxu1 %v1437_v56 }
  0x91   :  { %593 = vmatprep.subr.bf16.mxu1 %v1438_v57 }
  0x92   :  { %855 = vmatpush1.bf16.msra.mxu0 %v1372_v23  ;;  %v1829_v23 = vld [vmem:[#allocation4] sm:$0xff] }
  0x93   :  { %856 = vmatprep.subr.bf16.mxu0 %v1377_v26  ;;  %v1831_v26 = vld [vmem:[#allocation4 + $0x10] sm:$0xff] }
  0x94   :  { %594 = vmatpush1.bf16.msra.mxu1 %v1440_v60 }
  0x95   :  { %381 = vmatmul.mubr.bf16.gmra.mrb[4].mxu0 %v245_v31  ;;  %595 = vmatprep.subr.bf16.mxu1 %v1441_v61  ;;  %v676_v31 = vpack.c.bf16 %v1831_v26, %v1829_v23 }
  0x96   :  { %857 = vmatpush1.bf16.msra.mxu0 %v1375_v33  ;;  %884 = vmatprep.mubr.bf16.mxu0 %v677_v35  ;;  %v1841_v33 = vld [vmem:[#allocation4 + $0x20] sm:$0xff] }
  0x97   :  { %858 = vmatprep.subr.bf16.mxu0 %v1380_v34  ;;  %v1843_v34 = vld [vmem:[#allocation4 + $0x30] sm:$0xff] }
  0x98   :  { %596 = vmatpush1.bf16.msra.mxu1 %v1443_v0  ;;  %v678_v35 = vpack.c.bf16 %v1843_v34, %v1841_v33  ;;  %v1465_v0 = vld [vmem:[#allocation10] ss:$8 sps:$4 sm:$0xff]  }
  0x99   :  { %597 = vmatprep.subr.bf16.mxu1 %v1444_v1 }
  0x9a   :  { %859 = vmatpush1.bf16.msra.mxu0 %v1378_v38  ;;  %v1461_v38 = vld [vmem:[#allocation7 + $0xe0] ss:$8 sps:$4 sm:$0xff]  }
  0x9b   :  { %860 = vmatprep.subr.bf16.mxu0 %v1383_v39  ;;  %v1462_v39 = vld [vmem:[#allocation7 + $0xf4] ss:$8 sps:$4 sm:$0xff]  }
  0x9c   :  { %598 = vmatpush1.bf16.msra.mxu1 %v1446_v4 }
  0x9d   :  { %599 = vmatprep.subr.bf16.mxu1 %v1447_v5 }
  0x9e   :  { %861 = vmatpush1.bf16.msra.mxu0 %v1381_v42  ;;  %v248_v42 = vlaneseq }
  0x9f   :  { %862 = vmatprep.subr.bf16.mxu0 %v1386_v43 }
  0xa0   :  { %600 = vmatpush1.bf16.msra.mxu1 %v1449_v8  ;;  %v249_v43 = vshrl.u32 %v248_v42, 7  ;;  %v1494_v42 = vld [vmem:[#allocation10 + $0x94] ss:$8 sps:$4 sm:$0xff]  }
  0xa1   :  { %601 = vmatprep.subr.bf16.mxu1 %v1450_v9 }
  0xa2   :  { %863 = vmatpush1.bf16.msra.mxu0 %v1384_v46  ;;  %v1847_v44 = vsub.s32 0, %v249_v43  ;;  %v1852_v46 = vsub.s32 1, %v249_v43  ;;  %v1492_v43 = vld [vmem:[#allocation10 + $0x90] ss:$8 sps:$4 sm:$0xff]  }
  0xa3   :  { %864 = vmatprep.subr.bf16.mxu0 %v1389_v47 }
  0xa4   :  { %602 = vmatpush1.bf16.msra.mxu1 %v1452_v12  ;;  %v251_v47 = vrot.slane %v246_v45, %v1847_v44  ;;  %v255_v48 = vrot.slane %v246_v45, %v1852_v46  ;;  %v1497_v45 = vld [vmem:[#allocation10 + $0xa4] ss:$8 sps:$4 sm:$0xff]  }
  0xa5   :  { %603 = vmatprep.subr.bf16.mxu1 %v1453_v13 }
  0xa6   :  { %865 = vmatpush1.bf16.msra.mxu0 %v1387_v49 }
  0xa7   :  { %866 = vmatprep.subr.bf16.mxu0 %v1392_v51 }
  0xa8   :  { %604 = vmatpush1.bf16.msra.mxu1 %v1455_v16 }
  0xa9   :  { %605 = vmatprep.subr.bf16.mxu1 %v1456_v19  ;;  %v1471_v19 = vld [vmem:[#allocation10 + $0x20] ss:$8 sps:$4 sm:$0xff]  }
  0xaa   :  { %867 = vmatpush1.bf16.msra.mxu0 %v1390_v54 }
  0xab   :  { %868 = vmatprep.subr.bf16.mxu0 %v1395_v55 }
  0xac   :  { %606 = vmatpush1.bf16.msra.mxu1 %v1458_v36  ;;  %v1485_v36 = vld [vmem:[#allocation10 + $0x64] ss:$8 sps:$4 sm:$0xff]  }
  0xad   :  { %607 = vmatprep.subr.bf16.mxu1 %v1459_v37  ;;  %v1483_v37 = vld [vmem:[#allocation10 + $0x60] ss:$8 sps:$4 sm:$0xff]  }
  0xae   :  { %869 = vmatpush1.bf16.msra.mxu0 %v1393_v58 }
  0xaf   :  { %870 = vmatprep.subr.bf16.mxu0 %v1398_v59 }
  0xb0   :  { %608 = vmatpush1.bf16.msra.mxu1 %v1461_v38  ;;  %v1488_v38 = vld [vmem:[#allocation10 + $0x74] ss:$8 sps:$4 sm:$0xff]  }
  0xb1   :  { %609 = vmatprep.subr.bf16.mxu1 %v1462_v39  ;;  %v1486_v39 = vld [vmem:[#allocation10 + $0x70] ss:$8 sps:$4 sm:$0xff]  }
  0xb2   :  { %871 = vmatpush1.bf16.msra.mxu0 %v1396_v62 }
  0xb3   :  { %872 = vmatprep.subr.bf16.mxu0 %v1401_v63 }
  0xb4   :  { %610 = vmatpush1.bf16.msra.mxu1 %v1464_v40  ;;  %v1491_v40 = vld [vmem:[#allocation10 + $0x84] ss:$8 sps:$4 sm:$0xff]  }
  0xb5   :  { %1097 = vmatprep.subr.bf16.mxu1 %v1467_v41  ;;  %v1489_v41 = vld [vmem:[#allocation10 + $0x80] ss:$8 sps:$4 sm:$0xff]  }
  0xb6   :  { %873 = vmatpush1.bf16.msra.mxu0 %v1399_v2 }
  0xb7   :  { %874 = vmatprep.subr.bf16.mxu0 %v1404_v3  ;;  %v1470_v3 = vld [vmem:[#allocation10 + $0x14] ss:$8 sps:$4 sm:$0xff]  }
  0xba   :  { %875 = vmatpush1.bf16.msra.mxu0 %v1402_v6 }
  0xbb   :  { %876 = vmatprep.subr.bf16.mxu0 %v1407_v7 }
  0xbe   :  { %877 = vmatpush1.bf16.msra.mxu0 %v1405_v10 }
  0xbf   :  { %878 = vmatprep.subr.bf16.mxu0 %v1410_v11  ;;  %v1468_v11 = vld [vmem:[#allocation10 + $0x10] ss:$8 sps:$4 sm:$0xff]  }
  0xc2   :  { %879 = vmatpush1.bf16.msra.mxu0 %v1408_v14  ;;  %v1473_v14 = vld [vmem:[#allocation10 + $0x24] ss:$8 sps:$4 sm:$0xff]  }
  0xc3   :  { %880 = vmatprep.subr.bf16.mxu0 %v1413_v15 }
  0xc6   :  { %881 = vmatpush1.bf16.msra.mxu0 %v1411_v20 }
  0xc7   :  { %882 = vmatprep.subr.bf16.mxu0 %v1416_v21  ;;  %v1474_v21 = vld [vmem:[#allocation10 + $0x30] ss:$8 sps:$4 sm:$0xff]  }
  0xca   :  { %883 = vmatpush1.bf16.msra.mxu0 %v1414_v22  ;;  %v1479_v22 = vld [vmem:[#allocation10 + $0x44] ss:$8 sps:$4 sm:$0xff]  }
  0xcd   :  { %885 = vmatmul.mubr.bf16.vlgmr.msra.gmra.mrb[8].mxu0 %v676_v31  ;;  %v1477_v31 = vld [vmem:[#allocation10 + $0x40] ss:$8 sps:$4 sm:$0xff]  }
  0xce   :  { %894 = vmatprep.mubr.bf16.mxu0 %v679_v32  ;;  %v1482_v32 = vld [vmem:[#allocation10 + $0x54] ss:$8 sps:$4 sm:$0xff]  }
  0xd5   :  { %895 = vmatmul.mubr.bf16.gmra.mrb[12].mxu0 %v678_v35  ;;  %v1480_v35 = vld [vmem:[#allocation10 + $0x50] ss:$8 sps:$4 sm:$0xff]  }
 0x160   :  { %v372_v49 = vpop.f32.mrb[0].mxu0 }
 0x161   :  { %v373_v50 = vadd.f32 %v372_v49, %v251_v47  ;;  %v374_v51 = vpop.f32.mrb[1].mxu0  ;;  %v1498_v49 = vld [vmem:[#allocation10 + $0xb0] ss:$8 sps:$4 sm:$0xff]  }
 0x162   :  { %v1856_v52 = vadd.f32 %v374_v51, %v255_v48  ;;  %v376_v53 = vpop.f32.mrb[2].mxu0  ;;  %v1501_v51 = vld [vmem:[#allocation10 + $0xc0] ss:$8 sps:$4 sm:$0xff]  }
 0x163   :  { %v1859_v54 = vadd.f32 %v373_v50, %v1811_v17  ;;  %v377_v55 = vadd.f32 %v376_v53, %v251_v47  ;;  %v378_v56 = vpop.f32.mrb[3].mxu0  ;;  %v1503_v50 = vld [vmem:[#allocation10 + $0xc4] ss:$8 sps:$4 sm:$0xff]   ;;  %v1506_v53 = vld [vmem:[#allocation10 + $0xd4] ss:$8 sps:$4 sm:$0xff]  }
 0x164   :  { %v1861_v57 = vadd.f32 %v378_v56, %v255_v48  ;;  %v396_v60 = vmax.f32 %v1856_v52, 0.0  ;;  %v1504_v56 = vld [vmem:[#allocation10 + $0xd0] ss:$8 sps:$4 sm:$0xff]  }
 0x165   :  { %v395_v58 = vmax.f32 %v1859_v54, 0.0  ;;  %v1865_v59 = vadd.f32 %v377_v55, %v1813_v18  ;;  %v680_v55 = vld [vmem:[%s2026_s7] sm:$0x3] }
 0x166   :  { %v398_v61 = vmax.f32 %v1861_v57, 0.0 }
 0x167   :  { %v397_v62 = vmax.f32 %v1865_v59, 0.0 }
 0x168   :  { %v382_v63 = vpop.f32.mrb[4].mxu0  ;;  %v404_v17 = vpack.c.bf16 %v398_v61, %v396_v60 }
 0x169   :  { %v383_v1 = vadd.f32 %v382_v63, %v251_v47  ;;  %v384_v2 = vpop.f32.mrb[5].mxu0  ;;  %v403_v18 = vpack.c.bf16 %v397_v62, %v395_v58  ;;  %v685_v63 = vrot.slane %v680_v55, %v1847_v44 }
 0x16a   :  { %v1878_v4 = vadd.f32 %v384_v2, %v255_v48  ;;  %v386_v5 = vpop.f32.mrb[6].mxu0  ;;  %611 = vmatprep.mubr.bf16.mxu1 %v404_v17  ;;  %v1509_v17 = vld [vmem:[#allocation10 + $0xe4] ss:$8 sps:$4 sm:$0xff]   ;;  %v1507_v2 = vld [vmem:[#allocation10 + $0xe0] ss:$8 sps:$4 sm:$0xff]  }
 0x16b   :  { %v1881_v6 = vadd.f32 %v383_v1, %v1817_v24  ;;  %v387_v7 = vadd.f32 %v386_v5, %v251_v47  ;;  %v388_v8 = vpop.f32.mrb[7].mxu0  ;;  %612 = vmatmul.mubr.bf16.vlgmr.msra.gmra.mrb[0].mxu1 %v403_v18  ;;  %v1495_v47 = vld [vmem:[#allocation10 + $0xa0] ss:$8 sps:$4 sm:$0xff]   ;;  %v1512_v5 = vld [vmem:[#allocation10 + $0xf4] ss:$8 sps:$4 sm:$0xff]  }
 0x16c   :  { %v400_v9 = vmax.f32 %v1878_v4, 0.0  ;;  %v1884_v10 = vadd.f32 %v388_v8, %v255_v48  ;;  %1098 = vmatpush1.bf16.msra.mxu1 %v1465_v0  ;;  %v1500_v48 = vld [vmem:[#allocation10 + $0xb4] ss:$8 sps:$4 sm:$0xff]   ;;  %v689_v0 = vrot.slane %v680_v55, %v1852_v46  ;;  %v925_v4 = vld [vmem:[%s2028_s9] sm:$0x3] }
 0x16d   :  { %v399_v12 = vmax.f32 %v1881_v6, 0.0  ;;  %v1888_v13 = vadd.f32 %v387_v7, %v1819_v25  ;;  %1099 = vmatprep.subr.bf16.mxu1 %v1470_v3  ;;  %v1476_v25 = vld [vmem:[#allocation10 + $0x34] ss:$8 sps:$4 sm:$0xff]  }
 0x16e   :  { %v402_v15 = vmax.f32 %v1884_v10, 0.0  ;;  %v934_v10 = vrot.slane %v925_v4, %v1852_v46 }
 0x16f   :  { %v401_v24 = vmax.f32 %v1888_v13, 0.0 }
 0x170   :  { %v406_v16 = vpack.c.bf16 %v402_v15, %v400_v9  ;;  %1100 = vmatpush1.bf16.msra.mxu1 %v1468_v11 }
 0x171   :  { %v405_v20 = vpack.c.bf16 %v401_v24, %v399_v12  ;;  %1101 = vmatprep.subr.bf16.mxu1 %v1473_v14 }
 0x172   :  { %621 = vmatprep.mubr.bf16.mxu1 %v406_v16 }
 0x173   :  { %622 = vmatmul.mubr.bf16.gmra.mrb[4].mxu1 %v405_v20  ;;  %v1510_v20 = vld [vmem:[#allocation10 + $0xf0] ss:$8 sps:$4 sm:$0xff]  }
 0x174   :  { %1102 = vmatpush1.bf16.msra.mxu1 %v1471_v19 }
 0x175   :  { %1103 = vmatprep.subr.bf16.mxu1 %v1476_v25 }
 0x178   :  { %1104 = vmatpush1.bf16.msra.mxu1 %v1474_v21 }
 0x179   :  { %1105 = vmatprep.subr.bf16.mxu1 %v1479_v22 }
 0x17c   :  { %1106 = vmatpush1.bf16.msra.mxu1 %v1477_v31 }
 0x17d   :  { %1107 = vmatprep.subr.bf16.mxu1 %v1482_v32 }
 0x180   :  { %1108 = vmatpush1.bf16.msra.mxu1 %v1480_v35 }
 0x181   :  { %1109 = vmatprep.subr.bf16.mxu1 %v1485_v36 }
 0x184   :  { %1110 = vmatpush1.bf16.msra.mxu1 %v1483_v37 }
 0x185   :  { %1111 = vmatprep.subr.bf16.mxu1 %v1488_v38 }
 0x188   :  { %1112 = vmatpush1.bf16.msra.mxu1 %v1486_v39 }
 0x189   :  { %1113 = vmatprep.subr.bf16.mxu1 %v1491_v40 }
 0x18c   :  { %1114 = vmatpush1.bf16.msra.mxu1 %v1489_v41 }
 0x18d   :  { %1115 = vmatprep.subr.bf16.mxu1 %v1494_v42 }
 0x190   :  { %1116 = vmatpush1.bf16.msra.mxu1 %v1492_v43 }
 0x191   :  { %1117 = vmatprep.subr.bf16.mxu1 %v1497_v45 }
 0x194   :  { %1118 = vmatpush1.bf16.msra.mxu1 %v1495_v47 }
 0x195   :  { %1119 = vmatprep.subr.bf16.mxu1 %v1500_v48 }
 0x198   :  { %1120 = vmatpush1.bf16.msra.mxu1 %v1498_v49 }
 0x199   :  { %1121 = vmatprep.subr.bf16.mxu1 %v1503_v50 }
 0x19c   :  { %1122 = vmatpush1.bf16.msra.mxu1 %v1501_v51 }
 0x19d   :  { %1123 = vmatprep.subr.bf16.mxu1 %v1506_v53 }
 0x1a0   :  { %v886_v1 = vpop.f32.mrb[8].mxu0  ;;  %1124 = vmatpush1.bf16.msra.mxu1 %v1504_v56 }
 0x1a1   :  { %v887_v18 = vadd.f32 %v886_v1, %v685_v63  ;;  %v888_v3 = vpop.f32.mrb[9].mxu0  ;;  %1125 = vmatprep.subr.bf16.mxu1 %v1509_v17 }
 0x1a2   :  { %v889_v7 = vadd.f32 %v888_v3, %v689_v0  ;;  %v890_v8 = vpop.f32.mrb[10].mxu0 }
 0x1a3   :  { %v891_v11 = vadd.f32 %v890_v8, %v685_v63  ;;  %v892_v14 = vpop.f32.mrb[11].mxu0  ;;  %v1909_v25 = vadd.f32 %v887_v18, %v1829_v23 }
 0x1a4   :  { %v1906_v16 = vadd.f32 %v889_v7, %v1821_v27  ;;  %v893_v19 = vadd.f32 %v892_v14, %v689_v0  ;;  %1126 = vmatpush1.bf16.msra.mxu1 %v1507_v2 }
 0x1a5   :  { %v1912_v21 = vadd.f32 %v891_v11, %v1831_v26  ;;  %1127 = vmatprep.subr.bf16.mxu1 %v1512_v5  ;;  %v913_v36 = vmax.f32 %v1909_v25, 0.0 }
 0x1a6   :  { %v1915_v22 = vadd.f32 %v893_v19, %v1823_v28  ;;  %v914_v32 = vmax.f32 %v1906_v16, 0.0 }
 0x1a7   :  { %v915_v31 = vmax.f32 %v1912_v21, 0.0 }
 0x1a8   :  { %v916_v27 = vmax.f32 %v1915_v22, 0.0  ;;  %v896_v35 = vpop.f32.mrb[12].mxu0  ;;  %1128 = vmatpush1.bf16.msra.mxu1 %v1510_v20 }
 0x1a9   :  { %v897_v37 = vadd.f32 %v896_v35, %v685_v63  ;;  %v898_v23 = vpop.f32.mrb[13].mxu0  ;;  %v921_v26 = vpack.c.bf16 %v915_v31, %v913_v36 }
 0x1aa   :  { %v899_v38 = vadd.f32 %v898_v23, %v689_v0  ;;  %v900_v39 = vpop.f32.mrb[14].mxu0  ;;  %v922_v28 = vpack.c.bf16 %v916_v27, %v914_v32 }
 0x1ab   :  { %v901_v40 = vadd.f32 %v900_v39, %v685_v63  ;;  %v902_v41 = vpop.f32.mrb[15].mxu0  ;;  %v1933_v45 = vadd.f32 %v897_v37, %v1841_v33 }
 0x1ac   :  { %v1930_v42 = vadd.f32 %v899_v38, %v1833_v29  ;;  %v903_v43 = vadd.f32 %v902_v41, %v689_v0  ;;  %1129 = vmatprep.mubr.bf16.mxu1 %v922_v28 }
 0x1ad   :  { %v1936_v47 = vadd.f32 %v901_v40, %v1843_v34  ;;  %1130 = vmatmul.mubr.bf16.vlgmr.msra.gmra.mrb[8].mxu1 %v921_v26  ;;  %v917_v29 = vmax.f32 %v1933_v45, 0.0 }
 0x1ae   :  { %v1939_v48 = vadd.f32 %v903_v43, %v1835_v30  ;;  %v918_v50 = vmax.f32 %v1930_v42, 0.0  ;;  %v407_v30 = vld [vmem:[%s2024_s5] sm:$0x3] }
 0x1af   :  { %v919_v49 = vmax.f32 %v1936_v47, 0.0  ;;  %v412_v53 = vrot.slane %v407_v30, %v1847_v44  ;;  %v416_v55 = vrot.slane %v407_v30, %v1852_v46 }
 0x1b0   :  { %v920_v51 = vmax.f32 %v1939_v48, 0.0 }
 0x1b1   :  { %v923_v34 = vpack.c.bf16 %v919_v49, %v917_v29 }
 0x1b2   :  { %v924_v33 = vpack.c.bf16 %v920_v51, %v918_v50 }
 0x1b4   :  { %1139 = vmatprep.mubr.bf16.mxu1 %v924_v33 }
 0x1b5   :  { %1140 = vmatmul.mubr.bf16.gmra.mrb[12].mxu1 %v923_v34 }
 0x23e   :  { %v613_v56 = vpop.f32.mrb[0].mxu1 }
 0x23f   :  { %v614_v63 = vadd.f32 %v613_v56, %v412_v53  ;;  %v615_v17 = vpop.f32.mrb[1].mxu1 }
 0x240   :  { %v616_v0 = vadd.f32 %v615_v17, %v416_v55  ;;  %v617_v1 = vpop.f32.mrb[2].mxu1 }
 0x241   :  { %v632_v2 = vadd.f32 %v614_v63, %v395_v58  ;;  %v618_v18 = vadd.f32 %v617_v1, %v412_v53  ;;  %v619_v3 = vpop.f32.mrb[3].mxu1 }
 0x242   :  { %v633_v5 = vadd.f32 %v616_v0, %v396_v60  ;;  %v620_v7 = vadd.f32 %v619_v3, %v416_v55 }
 0x243   :  { %v640_v8 = vmax.f32 %v632_v2, 0.0  ;;  %v634_v11 = vadd.f32 %v618_v18, %v397_v62 }
 0x244   :  { %v641_v14 = vmax.f32 %v633_v5, 0.0  ;;  %v635_v19 = vadd.f32 %v620_v7, %v398_v61 }
 0x245   :  { %v642_v20 = vmax.f32 %v634_v11, 0.0 }
 0x246   :  { %v1326_v35 = vpack.c.bf16 %v641_v14, %v640_v8  ;;  %v643_v37 = vmax.f32 %v635_v19, 0.0  ;;  %v623_v23 = vpop.f32.mrb[4].mxu1 }
 0x247   :  { %v624_v54 = vadd.f32 %v623_v23, %v412_v53  ;;  %v625_v58 = vpop.f32.mrb[5].mxu1 }
 0x248   :  { %672 = vst [vmem:[%s2029_s10] sm:$0xff] %v1326_v35  ;;  %v1327_v52 = vpack.c.bf16 %v643_v37, %v642_v20  ;;  %v626_v60 = vadd.f32 %v625_v58, %v416_v55  ;;  %v627_v38 = vpop.f32.mrb[6].mxu1 }
 0x249   :  { %v636_v59 = vadd.f32 %v624_v54, %v399_v12  ;;  %v628_v62 = vadd.f32 %v627_v38, %v412_v53  ;;  %v629_v39 = vpop.f32.mrb[7].mxu1 }
 0x24a   :  { %673 = vst [vmem:[%s2029_s10 + $0x8] sm:$0xff] %v1327_v52  ;;  %v637_v57 = vadd.f32 %v626_v60, %v400_v9  ;;  %v630_v61 = vadd.f32 %v629_v39, %v416_v55  ;;  %v930_v9 = vrot.slane %v925_v4, %v1847_v44 }
 0x24b   :  { %v644_v28 = vmax.f32 %v636_v59, 0.0  ;;  %v638_v26 = vadd.f32 %v628_v62, %v401_v24 }
 0x24c   :  { %v645_v40 = vmax.f32 %v637_v57, 0.0  ;;  %v639_v41 = vadd.f32 %v630_v61, %v402_v15 }
 0x24d   :  { %v646_v6 = vmax.f32 %v638_v26, 0.0 }
 0x24e   :  { %v1328_v12 = vpack.c.bf16 %v645_v40, %v644_v28  ;;  %v647_v43 = vmax.f32 %v639_v41, 0.0 }
 0x250   :  { %674 = vst [vmem:[%s2029_s10 + $0x10] sm:$0xff] %v1328_v12  ;;  %v1329_v33 = vpack.c.bf16 %v647_v43, %v646_v6 }
 0x252   :  { %675 = vst [vmem:[%s2029_s10 + $0x18] sm:$0xff] %v1329_v33 }
 0x280   :  { %v1131_v13 = vpop.f32.mrb[8].mxu1 }
 0x281   :  { %v1132_v15 = vadd.f32 %v1131_v13, %v930_v9  ;;  %v1133_v24 = vpop.f32.mrb[9].mxu1 }
 0x282   :  { %v1134_v34 = vadd.f32 %v1133_v24, %v934_v10  ;;  %v1135_v30 = vpop.f32.mrb[10].mxu1 }
 0x283   :  { %v1150_v53 = vadd.f32 %v1132_v15, %v913_v36  ;;  %v1136_v55 = vadd.f32 %v1135_v30, %v930_v9  ;;  %v1137_v56 = vpop.f32.mrb[11].mxu1 }
 0x284   :  { %v1151_v63 = vadd.f32 %v1134_v34, %v914_v32  ;;  %v1138_v17 = vadd.f32 %v1137_v56, %v934_v10 }
 0x285   :  { %v1158_v0 = vmax.f32 %v1150_v53, 0.0  ;;  %v1152_v44 = vadd.f32 %v1136_v55, %v915_v31 }
 0x286   :  { %v1159_v1 = vmax.f32 %v1151_v63, 0.0  ;;  %v1153_v46 = vadd.f32 %v1138_v17, %v916_v27 }
 0x287   :  { %v1160_v2 = vmax.f32 %v1152_v44, 0.0 }
 0x288   :  { %v1330_v18 = vpack.c.bf16 %v1159_v1, %v1158_v0  ;;  %v1161_v3 = vmax.f32 %v1153_v46, 0.0  ;;  %v1141_v5 = vpop.f32.mrb[12].mxu1 }
 0x289   :  { %v1142_v25 = vadd.f32 %v1141_v5, %v930_v9  ;;  %v1143_v36 = vpop.f32.mrb[13].mxu1 }
 0x28a   :  { %1190 = vst [vmem:[%s2030_s11] sm:$0xff] %v1330_v18  ;;  %v1331_v16 = vpack.c.bf16 %v1161_v3, %v1160_v2  ;;  %v1144_v32 = vadd.f32 %v1143_v36, %v934_v10  ;;  %v1145_v7 = vpop.f32.mrb[14].mxu1 }
 0x28b   :  { %v1154_v21 = vadd.f32 %v1142_v25, %v917_v29  ;;  %v1146_v31 = vadd.f32 %v1145_v7, %v930_v9  ;;  %v1147_v8 = vpop.f32.mrb[15].mxu1 }
 0x28c   :  { %1191 = vst [vmem:[%s2030_s11 + $0x8] sm:$0xff] %v1331_v16  ;;  %v1155_v22 = vadd.f32 %v1144_v32, %v918_v50  ;;  %v1148_v27 = vadd.f32 %v1147_v8, %v934_v10 }
 0x28d   :  { %v1162_v11 = vmax.f32 %v1154_v21, 0.0  ;;  %v1156_v14 = vadd.f32 %v1146_v31, %v919_v49 }
 0x28e   :  { %v1163_v19 = vmax.f32 %v1155_v22, 0.0  ;;  %v1157_v20 = vadd.f32 %v1148_v27, %v920_v51 }
 0x28f   :  { %v1164_v45 = vmax.f32 %v1156_v14, 0.0 }
 0x290   :  { %v1332_v29 = vpack.c.bf16 %v1163_v19, %v1162_v11  ;;  %v1165_v35 = vmax.f32 %v1157_v20, 0.0 }
 0x292   :  { %1192 = vst [vmem:[%s2030_s11 + $0x10] sm:$0xff] %v1332_v29  ;;  %v1333_v37 = vpack.c.bf16 %v1165_v35, %v1164_v45 }
 0x294   :  { %1193 = vst [vmem:[%s2030_s11 + $0x18] sm:$0xff] %v1333_v37 }
 0x295   :  { %1202 = vsyncpa [#allocation3], 1 }
 0x296   :  { %1203 = vsyncpa [#allocation5], 1 }
 0x297   :  { %1204 = vsyncpa [#allocation8], 1 }
 0x298   :  { %1205 = vsyncpa [#allocation11], 1 }

</bundles_post_ra>
